<compile_context>
chip_gen: v6e
topology: v6e:2x2x1
jax: 0.10.0
libtpu: 0.0.40
codegen_flags: <defaults>
</compile_context>

<pallas_src>
import numpy as np
import jax
import jax.numpy as jnp
from jax import lax
from jax.experimental import pallas as pl
from jax.experimental.pallas import tpu as pltpu


# -----------------------------------------------------------------------------
# Synthetic model config (mirrors dataset.category_to_attrs / attr_encoders)
# -----------------------------------------------------------------------------
FEATURE_DIM = 256          # synthetic backbone width (efficientnet_b5 would be 2048)
NC_PAD = 128               # lane-dense classifier width (>= max num_classes)
CATEGORY_TO_ATTRS = {"shirts": 3, "pants": 2}
NUM_CLASSES = {
    ("shirts", 0): 5, ("shirts", 1): 3, ("shirts", 2): 4,
    ("pants", 0): 4, ("pants", 1): 6,
}
HEAD_LIST = [(cat, i) for cat, n in CATEGORY_TO_ATTRS.items() for i in range(n)]
NUM_HEADS = len(HEAD_LIST)


def _max_classes_per_position():
    mcp = {}
    for cat, n in CATEGORY_TO_ATTRS.items():
        for i in range(n):
            mcp[i] = max(mcp.get(i, 0), NUM_CLASSES[(cat, i)])
    return mcp


MAX_CLASSES_PER_POSITION = _max_classes_per_position()


# -----------------------------------------------------------------------------
# Shared math (used inside kernels and in the pure-JAX reference)
# -----------------------------------------------------------------------------
def _gelu_exact(x):
    # PyTorch nn.GELU() default = exact erf formulation.
    return 0.5 * x * (1.0 + lax.erf(x * 0.7071067811865476))


def _gelu_ln(h, gamma, beta):
    # GELU -> LayerNorm(eps=1e-5), all math in f32.  One-pass variance
    # (E[x^2]-E[x]^2) halves the cross-lane XLU reductions.
    h = _gelu_exact(h)
    mean = jnp.mean(h, axis=-1, keepdims=True)
    var = jnp.maximum(jnp.mean(h * h, axis=-1, keepdims=True) - mean * mean, 0.0)
    h = (h - mean) * lax.rsqrt(var + 1e-5)
    return h * gamma + beta


def _bf16_dot(x, w):
    # bf16 operands on the MXU, f32 accumulation.
    return jnp.dot(x.astype(jnp.bfloat16), w, preferred_element_type=jnp.float32)


# -----------------------------------------------------------------------------
# Pallas kernels
# -----------------------------------------------------------------------------
def _trunk_kernel(x_ref, w1_ref, bgb1_ref, w2_ref, bgb2_ref, o_ref):
    # x_ref: (B_pad, C, H*W) f32, w*: bf16, bgb*: (8, N) f32 rows = (bias, gamma, beta)
    pooled = jnp.mean(x_ref[...], axis=-1)                   # GAP -> (B_pad, C) f32
    bgb1 = bgb1_ref[...]
    h = _bf16_dot(pooled, w1_ref[...]) + bgb1[0:1]           # folded backbone+fp1 linear
    h = _gelu_ln(h, bgb1[1:2], bgb1[2:3])
    bgb2 = bgb2_ref[...]
    h = _bf16_dot(h, w2_ref[...]) + bgb2[0:1]                # fp2 linear
    h = _gelu_ln(h, bgb2[1:2], bgb2[2:3])
    o_ref[...] = h.astype(o_ref.dtype)                       # (B_pad, 512) bf16


def _heads_kernel(feats_ref, w1_ref, bgb1_ref, w2_ref, bgb2_ref,
                  w3_ref, b3_ref, rowmask_ref, o_ref):
    # One grid step == one (category, attr) head; intermediates stay on-chip.
    f = feats_ref[...]                                       # (B_pad, 512) bf16
    bgb1 = bgb1_ref[0]                                       # (8, 512) f32
    h = _bf16_dot(f, w1_ref[0]) + bgb1[0:1]
    h = _gelu_ln(h, bgb1[1:2], bgb1[2:3])
    bgb2 = bgb2_ref[0]                                       # (8, 256) f32
    h = _bf16_dot(h, w2_ref[0]) + bgb2[0:1]
    h = _gelu_ln(h, bgb2[1:2], bgb2[2:3])
    # Lane-dense classifier: bias is already -inf in padded class columns and
    # rowmask is 0 / -inf per row (category selection), so the store is the
    # final "-inf combined" logits slab for this head.
    logits = _bf16_dot(h, w3_ref[0]) + b3_ref[0][0:1] + rowmask_ref[0]
    o_ref[0] = logits


# -----------------------------------------------------------------------------
# Wrappers
# -----------------------------------------------------------------------------
def _full_spec(shape):
    nd = len(shape)
    return pl.BlockSpec(shape, lambda *_: (0,) * nd)


def trunk_forward(params, x):
    B, C, H, W = x.shape
    b_pad = max(8, -(-B // 8) * 8)                  # pad batch to a full sublane group
    xr = x.reshape(B, C, H * W).astype(jnp.float32)
    if b_pad != B:
        xr = jnp.pad(xr, ((0, b_pad - B), (0, 0), (0, 0)))
    return pl.pallas_call(
        _trunk_kernel,
        out_shape=jax.ShapeDtypeStruct((b_pad, 512), jnp.bfloat16),
        grid=(1,),
        in_specs=[
            _full_spec(xr.shape),
            _full_spec(params["trunk_w1"].shape),
            _full_spec(params["trunk_bgb1"].shape),
            _full_spec(params["trunk_w2"].shape),
            _full_spec(params["trunk_bgb2"].shape),
        ],
        out_specs=_full_spec((b_pad, 512)),
    )(xr, params["trunk_w1"], params["trunk_bgb1"],
      params["trunk_w2"], params["trunk_bgb2"])


def heads_forward(params, feats, categories):
    b_pad = feats.shape[0]
    # Additive per-(head, row) mask: 0 where the row's category owns this head,
    # -inf otherwise (incl. batch padding rows).  Built at trace time from the
    # host-side category list, exactly like the Python loop in the PyTorch forward.
    mask = np.full((NUM_HEADS, b_pad, 1), -np.inf, np.float32)
    for h, (cat, _attr) in enumerate(HEAD_LIST):
        for b, c in enumerate(categories):
            if c == cat:
                mask[h, b, 0] = 0.0
    rowmask = jnp.asarray(mask)

    return pl.pallas_call(
        _heads_kernel,
        out_shape=jax.ShapeDtypeStruct((NUM_HEADS, b_pad, NC_PAD), jnp.float32),
        grid=(NUM_HEADS,),
        in_specs=[
            pl.BlockSpec((b_pad, 512), lambda h: (0, 0)),          # shared features
            pl.BlockSpec((1, 512, 512), lambda h: (h, 0, 0)),      # w1 (per head)
            pl.BlockSpec((1, 8, 512), lambda h: (h, 0, 0)),        # packed b/gamma/beta 1
            pl.BlockSpec((1, 512, 256), lambda h: (h, 0, 0)),      # w2
            pl.BlockSpec((1, 8, 256), lambda h: (h, 0, 0)),        # packed b/gamma/beta 2
            pl.BlockSpec((1, 256, NC_PAD), lambda h: (h, 0, 0)),   # w3 (zero-padded cols)
            pl.BlockSpec((1, 8, NC_PAD), lambda h: (h, 0, 0)),     # b3 (-inf padded cols)
            pl.BlockSpec((1, b_pad, 1), lambda h: (h, 0, 0)),      # row category mask
        ],
        out_specs=pl.BlockSpec((1, b_pad, NC_PAD), lambda h: (h, 0, 0)),
        compiler_params=pltpu.CompilerParams(
            dimension_semantics=("parallel",)),   # v7x: heads split across both TCs
    )(feats, params["h_w1"], params["h_bgb1"], params["h_w2"], params["h_bgb2"],
      params["h_w3"], params["h_b3"], rowmask)


# -----------------------------------------------------------------------------
# Parameter construction (deterministic synthetic init)
# -----------------------------------------------------------------------------
def _pack_bgb(b, g, beta):
    n = b.shape[-1]
    pad = jnp.zeros((5, n), jnp.float32)
    return jnp.concatenate(
        [b.reshape(1, n).astype(jnp.float32),
         g.reshape(1, n).astype(jnp.float32),
         beta.reshape(1, n).astype(jnp.float32), pad], axis=0)     # (8, n)


def init_params(key):
    keys = iter(jax.random.split(key, 64))

    def dense(fan_in, fan_out):
        w = jax.random.normal(next(keys), (fan_in, fan_out), jnp.float32) * 0.02
        b = jnp.zeros((fan_out,), jnp.float32)
        return w, b

    def ln(dim):
        return jnp.ones((dim,), jnp.float32), jnp.zeros((dim,), jnp.float32)

    # TODO(synk): the pretrained timm efficientnet_b5 backbone is not reproducible
    # here; this is a synthetic GAP + linear stem with the same (B, feature_dim) contract.
    bb_w, bb_b = dense(4, FEATURE_DIM)
    fp1_w, fp1_b = dense(FEATURE_DIM, 1024)
    fp1_g, fp1_bt = ln(1024)
    fp2_w, fp2_b = dense(1024, 512)
    fp2_g, fp2_bt = ln(512)

    # Fold the (linear) backbone projection into fp1: no nonlinearity between them,
    # so (x@bb_w+bb_b)@fp1_w+fp1_b == x@(bb_w@fp1_w) + (bb_b@fp1_w + fp1_b).
    trunk_w1 = bb_w @ fp1_w                       # (4, 1024)
    trunk_b1 = bb_b @ fp1_w + fp1_b               # (1024,)

    params = {
        "trunk_w1": trunk_w1.astype(jnp.bfloat16),
        "trunk_bgb1": _pack_bgb(trunk_b1, fp1_g, fp1_bt),
        "trunk_w2": fp2_w.astype(jnp.bfloat16),
        "trunk_bgb2": _pack_bgb(fp2_b, fp2_g, fp2_bt),
    }

    w1s, bgb1s, w2s, bgb2s, w3s, b3s = [], [], [], [], [], []
    for cat, attr_idx in HEAD_LIST:
        nc = NUM_CLASSES[(cat, attr_idx)]
        w1, b1 = dense(512, 512); g1, bt1 = ln(512)
        w2, b2 = dense(512, 256); g2, bt2 = ln(256)
        w3, b3 = dense(256, nc)
        w1s.append(w1.astype(jnp.bfloat16))
        bgb1s.append(_pack_bgb(b1, g1, bt1))
        w2s.append(w2.astype(jnp.bfloat16))
        bgb2s.append(_pack_bgb(b2, g2, bt2))
        # Lane-dense classifier: zero-pad the weight, -inf-pad the bias so padded
        # class columns come out -inf with no extra pad/concat HLOs.
        w3p = jnp.zeros((256, NC_PAD), jnp.float32).at[:, :nc].set(w3)
        b3p = jnp.full((NC_PAD,), -jnp.inf, jnp.float32).at[:nc].set(b3)
        w3s.append(w3p.astype(jnp.bfloat16))
        b3s.append(_pack_bgb(b3p, jnp.zeros((NC_PAD,)), jnp.zeros((NC_PAD,))))

    params.update({
        "h_w1": jnp.stack(w1s), "h_bgb1": jnp.stack(bgb1s),
        "h_w2": jnp.stack(w2s), "h_bgb2": jnp.stack(bgb2s),
        "h_w3": jnp.stack(w3s), "h_b3": jnp.stack(b3s),
    })
    return params


# -----------------------------------------------------------------------------
# Forward pass (mirrors ProductAttributeModel.forward)
# -----------------------------------------------------------------------------
def product_attribute_forward(params, x, categories, n_attrs):
    B = x.shape[0]
    feats = trunk_forward(params, x)                         # (B_pad, 512) bf16
    head_logits = heads_forward(params, feats, categories)   # (NUM_HEADS, B_pad, 128) f32

    present = set(categories)
    max_attrs = int(max(n_attrs))
    outputs = []
    for attr_idx in range(max_attrs):
        if attr_idx not in MAX_CLASSES_PER_POSITION:
            outputs.append(None)
            continue
        max_classes = MAX_CLASSES_PER_POSITION[attr_idx]
        head_ids = [h for h, (cat, ai) in enumerate(HEAD_LIST)
                    if ai == attr_idx and cat in present]
        if not head_ids:
            outputs.append(None)
            continue
        # Each row belongs to exactly one category; non-owning heads emitted -inf
        # for it, so an elementwise max reproduces the scatter-combine exactly.
        combined = head_logits[head_ids[0]]
        for h in head_ids[1:]:
            combined = jnp.maximum(combined, head_logits[h])
        outputs.append(combined[:B, :max_classes])
    return outputs


# -----------------------------------------------------------------------------
# Pure-JAX reference (mirrors the PyTorch control flow, same bf16 matmul policy)
# -----------------------------------------------------------------------------
def reference_forward(params, x, categories, n_attrs):
    B, C, H, W = x.shape
    pooled = jnp.mean(x.reshape(B, C, H * W), axis=-1)

    def block(h, w, bgb):
        h = _bf16_dot(h, w) + bgb[0:1]
        return _gelu_ln(h, bgb[1:2], bgb[2:3])

    feats = block(pooled, params["trunk_w1"], params["trunk_bgb1"])
    feats = block(feats, params["trunk_w2"], params["trunk_bgb2"])
    feats = feats.astype(jnp.bfloat16)

    category_indices = {}
    for i, c in enumerate(categories):
        category_indices.setdefault(c, []).append(i)

    max_attrs = int(max(n_attrs))
    outputs = []
    for attr_idx in range(max_attrs):
        if attr_idx not in MAX_CLASSES_PER_POSITION:
            outputs.append(None)
            continue
        max_classes = MAX_CLASSES_PER_POSITION[attr_idx]
        attr_outputs = []
        for category, indices in category_indices.items():
            if attr_idx < CATEGORY_TO_ATTRS[category]:
                h = HEAD_LIST.index((category, attr_idx))
                idx = jnp.asarray(indices, jnp.int32)
                z = feats[idx]
                z = block(z, params["h_w1"][h], params["h_bgb1"][h])
                z = block(z, params["h_w2"][h], params["h_bgb2"][h])
                nc = NUM_CLASSES[(category, attr_idx)]
                logits = (_bf16_dot(z, params["h_w3"][h][:, :nc])
                          + params["h_b3"][h][0:1, :nc])
                if nc < max_classes:
                    pad = jnp.full((logits.shape[0], max_classes - nc),
                                   -jnp.inf, logits.dtype)
                    logits = jnp.concatenate([logits, pad], axis=1)
                attr_outputs.append((idx, logits))
        if attr_outputs:
            combined = jnp.full((len(categories), max_classes), -jnp.inf, jnp.float32)
            for idx, out in attr_outputs:
                combined = combined.at[idx].set(out)
            outputs.append(combined)
        else:
            outputs.append(None)
    return outputs


# -----------------------------------------------------------------------------
if __name__ == "__main__":
    key = jax.random.PRNGKey(0)
    k_param, k_x = jax.random.split(key)

    params = init_params(k_param)

    # batch=2, channels=4, spatial=16x16 (NCHW, like the PyTorch module)
    x = jax.random.normal(k_x, (2, 4, 16, 16), jnp.float32)
    categories = ["shirts", "pants"]
    n_attrs = [CATEGORY_TO_ATTRS[c] for c in categories]      # [3, 2]

    outs = product_attribute_forward(params, x, categories, n_attrs)
    outs = [o for o in outs if o is not None]
    jax.block_until_ready(outs)

    # shape / masking sanity checks (same contract as the PyTorch module)
    assert outs[0].shape == (2, 5)                  # attr 0: max classes = 5
    assert outs[1].shape == (2, 6)                  # attr 1: max classes = 6
    assert outs[2].shape == (2, 4)                  # attr 2: shirts only
    assert bool(jnp.all(jnp.isneginf(outs[2][1])))  # pants has no attr 2
    assert bool(jnp.isneginf(outs[0][1, 4]))        # pants attr 0: only 4 classes

    # numerical check against the pure-JAX mirror of the PyTorch control flow
    refs = [o for o in reference_forward(params, x, categories, n_attrs)
            if o is not None]
    for got, ref in zip(outs, refs):
        got = np.asarray(got); ref = np.asarray(ref)
        assert np.array_equal(np.isneginf(got), np.isneginf(ref))
        finite = np.isfinite(ref)
        np.testing.assert_allclose(got[finite], ref[finite], rtol=1e-2, atol=1e-2)

    print("KERNEL_OK")
</pallas_src>

<mosaic_0001>
module attributes {stable_mosaic.version = 11 : i64} {
  func.func @_trunk_kernel(%arg0: i32, %arg1: memref<8x4x256xf32, #tpu.memory_space<vmem>>, %arg2: memref<4x1024xbf16, #tpu.memory_space<vmem>>, %arg3: memref<8x1024xf32, #tpu.memory_space<vmem>>, %arg4: memref<1024x512xbf16, #tpu.memory_space<vmem>>, %arg5: memref<8x512xf32, #tpu.memory_space<vmem>>, %arg6: memref<8x512xbf16, #tpu.memory_space<vmem>>) attributes {dimension_semantics = [#tpu.dimension_semantics<arbitrary>], iteration_bounds = array<i64: 1>, scalar_prefetch = 0 : i64, scratch_operands = 0 : i64, tpu.core_type = #tpu.core_type<tc>, window_params = [{pipeline_mode = #tpu.pipeline_mode<synchronous>, transform_indices = @transform_0, window_bounds = array<i64: 8, 4, 256>}, {pipeline_mode = #tpu.pipeline_mode<synchronous>, transform_indices = @transform_1, window_bounds = array<i64: 4, 1024>}, {pipeline_mode = #tpu.pipeline_mode<synchronous>, transform_indices = @transform_2, window_bounds = array<i64: 8, 1024>}, {pipeline_mode = #tpu.pipeline_mode<synchronous>, transform_indices = @transform_3, window_bounds = array<i64: 1024, 512>}, {pipeline_mode = #tpu.pipeline_mode<synchronous>, transform_indices = @transform_4, window_bounds = array<i64: 8, 512>}, {pipeline_mode = #tpu.pipeline_mode<synchronous>, transform_indices = @transform_5, window_bounds = array<i64: 8, 512>}]} {
    %c0 = arith.constant 0 : index
    %c0_0 = arith.constant 0 : index
    %c0_1 = arith.constant 0 : index
    %0 = vector.load %arg1[%c0, %c0_0, %c0_1] : memref<8x4x256xf32, #tpu.memory_space<vmem>>, vector<8x4x256xf32>
    %cst = arith.constant dense<0.000000e+00> : vector<8x4xf32>
    %1 = vector.multi_reduction <add>, %0, %cst [2] : vector<8x4x256xf32> to vector<8x4xf32>
    %cst_2 = arith.constant 2.560000e+02 : f32
    %2 = vector.broadcast %cst_2 : f32 to vector<8x4xf32>
    %3 = arith.divf %1, %2 : vector<8x4xf32>
    %c0_3 = arith.constant 0 : index
    %c0_4 = arith.constant 0 : index
    %4 = vector.load %arg3[%c0_3, %c0_4] : memref<8x1024xf32, #tpu.memory_space<vmem>>, vector<8x1024xf32>
    %c0_5 = arith.constant 0 : index
    %c0_6 = arith.constant 0 : index
    %5 = vector.load %arg2[%c0_5, %c0_6] : memref<4x1024xbf16, #tpu.memory_space<vmem>>, vector<4x1024xbf16>
    %6 = arith.truncf %3 : vector<8x4xf32> to vector<8x4xbf16>
    %cst_7 = arith.constant dense<0.000000e+00> : vector<8x1024xf32>
    %7 = tpu.matmul %6, %5, %cst_7 {dimension_numbers = #tpu.dot_dimension_numbers<[1], [0], [0], [1], [0, 0, 1, 1], [], []>} : vector<8x4xbf16>, vector<4x1024xbf16>, vector<8x1024xf32> -> vector<8x1024xf32>
    %8 = vector.extract_strided_slice %4 {offsets = [0, 0], sizes = [1, 1024], strides = [1, 1]} : vector<8x1024xf32> to vector<1x1024xf32>
    %9 = vector.broadcast %8 : vector<1x1024xf32> to vector<8x1024xf32>
    %10 = arith.addf %7, %9 : vector<8x1024xf32>
    %11 = vector.extract_strided_slice %4 {offsets = [1, 0], sizes = [1, 1024], strides = [1, 1]} : vector<8x1024xf32> to vector<1x1024xf32>
    %12 = vector.extract_strided_slice %4 {offsets = [2, 0], sizes = [1, 1024], strides = [1, 1]} : vector<8x1024xf32> to vector<1x1024xf32>
    %cst_8 = arith.constant 5.000000e-01 : f32
    %13 = vector.broadcast %cst_8 : f32 to vector<8x1024xf32>
    %14 = arith.mulf %13, %10 : vector<8x1024xf32>
    %cst_9 = arith.constant 0.707106769 : f32
    %15 = vector.broadcast %cst_9 : f32 to vector<8x1024xf32>
    %16 = arith.mulf %10, %15 : vector<8x1024xf32>
    %17 = math.erf %16 : vector<8x1024xf32>
    %cst_10 = arith.constant 1.000000e+00 : f32
    %18 = vector.broadcast %cst_10 : f32 to vector<8x1024xf32>
    %19 = arith.addf %18, %17 : vector<8x1024xf32>
    %20 = arith.mulf %14, %19 : vector<8x1024xf32>
    %cst_11 = arith.constant dense<0.000000e+00> : vector<8xf32>
    %21 = vector.multi_reduction <add>, %20, %cst_11 [1] : vector<8x1024xf32> to vector<8xf32>
    %22 = vector.shape_cast %21 : vector<8xf32> to vector<8x1xf32>
    %cst_12 = arith.constant 1.024000e+03 : f32
    %23 = vector.broadcast %cst_12 : f32 to vector<8x1xf32>
    %24 = arith.divf %22, %23 : vector<8x1xf32>
    %25 = arith.mulf %20, %20 : vector<8x1024xf32>
    %cst_13 = arith.constant dense<0.000000e+00> : vector<8xf32>
    %26 = vector.multi_reduction <add>, %25, %cst_13 [1] : vector<8x1024xf32> to vector<8xf32>
    %27 = vector.shape_cast %26 : vector<8xf32> to vector<8x1xf32>
    %cst_14 = arith.constant 1.024000e+03 : f32
    %28 = vector.broadcast %cst_14 : f32 to vector<8x1xf32>
    %29 = arith.divf %27, %28 : vector<8x1xf32>
    %30 = arith.mulf %24, %24 : vector<8x1xf32>
    %31 = arith.subf %29, %30 : vector<8x1xf32>
    %cst_15 = arith.constant 0.000000e+00 : f32
    %32 = vector.broadcast %cst_15 : f32 to vector<8x1xf32>
    %33 = arith.maximumf %31, %32 : vector<8x1xf32>
    %34 = vector.broadcast %24 : vector<8x1xf32> to vector<8x1024xf32>
    %35 = arith.subf %20, %34 : vector<8x1024xf32>
    %cst_16 = arith.constant 9.99999974E-6 : f32
    %36 = vector.broadcast %cst_16 : f32 to vector<8x1xf32>
    %37 = arith.addf %33, %36 : vector<8x1xf32>
    %38 = math.rsqrt %37 : vector<8x1xf32>
    %39 = vector.broadcast %38 : vector<8x1xf32> to vector<8x1024xf32>
    %40 = arith.mulf %35, %39 : vector<8x1024xf32>
    %41 = vector.broadcast %11 : vector<1x1024xf32> to vector<8x1024xf32>
    %42 = arith.mulf %40, %41 : vector<8x1024xf32>
    %43 = vector.broadcast %12 : vector<1x1024xf32> to vector<8x1024xf32>
    %44 = arith.addf %42, %43 : vector<8x1024xf32>
    %c0_17 = arith.constant 0 : index
    %c0_18 = arith.constant 0 : index
    %45 = vector.load %arg5[%c0_17, %c0_18] : memref<8x512xf32, #tpu.memory_space<vmem>>, vector<8x512xf32>
    %c0_19 = arith.constant 0 : index
    %c0_20 = arith.constant 0 : index
    %46 = vector.load %arg4[%c0_19, %c0_20] : memref<1024x512xbf16, #tpu.memory_space<vmem>>, vector<1024x512xbf16>
    %47 = arith.truncf %44 : vector<8x1024xf32> to vector<8x1024xbf16>
    %cst_21 = arith.constant dense<0.000000e+00> : vector<8x512xf32>
    %48 = tpu.matmul %47, %46, %cst_21 {dimension_numbers = #tpu.dot_dimension_numbers<[1], [0], [0], [1], [0, 0, 1, 1], [], []>} : vector<8x1024xbf16>, vector<1024x512xbf16>, vector<8x512xf32> -> vector<8x512xf32>
    %49 = vector.extract_strided_slice %45 {offsets = [0, 0], sizes = [1, 512], strides = [1, 1]} : vector<8x512xf32> to vector<1x512xf32>
    %50 = vector.broadcast %49 : vector<1x512xf32> to vector<8x512xf32>
    %51 = arith.addf %48, %50 : vector<8x512xf32>
    %52 = vector.extract_strided_slice %45 {offsets = [1, 0], sizes = [1, 512], strides = [1, 1]} : vector<8x512xf32> to vector<1x512xf32>
    %53 = vector.extract_strided_slice %45 {offsets = [2, 0], sizes = [1, 512], strides = [1, 1]} : vector<8x512xf32> to vector<1x512xf32>
    %cst_22 = arith.constant 5.000000e-01 : f32
    %54 = vector.broadcast %cst_22 : f32 to vector<8x512xf32>
    %55 = arith.mulf %54, %51 : vector<8x512xf32>
    %cst_23 = arith.constant 0.707106769 : f32
    %56 = vector.broadcast %cst_23 : f32 to vector<8x512xf32>
    %57 = arith.mulf %51, %56 : vector<8x512xf32>
    %58 = math.erf %57 : vector<8x512xf32>
    %cst_24 = arith.constant 1.000000e+00 : f32
    %59 = vector.broadcast %cst_24 : f32 to vector<8x512xf32>
    %60 = arith.addf %59, %58 : vector<8x512xf32>
    %61 = arith.mulf %55, %60 : vector<8x512xf32>
    %cst_25 = arith.constant dense<0.000000e+00> : vector<8xf32>
    %62 = vector.multi_reduction <add>, %61, %cst_25 [1] : vector<8x512xf32> to vector<8xf32>
    %63 = vector.shape_cast %62 : vector<8xf32> to vector<8x1xf32>
    %cst_26 = arith.constant 5.120000e+02 : f32
    %64 = vector.broadcast %cst_26 : f32 to vector<8x1xf32>
    %65 = arith.divf %63, %64 : vector<8x1xf32>
    %66 = arith.mulf %61, %61 : vector<8x512xf32>
    %cst_27 = arith.constant dense<0.000000e+00> : vector<8xf32>
    %67 = vector.multi_reduction <add>, %66, %cst_27 [1] : vector<8x512xf32> to vector<8xf32>
    %68 = vector.shape_cast %67 : vector<8xf32> to vector<8x1xf32>
    %cst_28 = arith.constant 5.120000e+02 : f32
    %69 = vector.broadcast %cst_28 : f32 to vector<8x1xf32>
    %70 = arith.divf %68, %69 : vector<8x1xf32>
    %71 = arith.mulf %65, %65 : vector<8x1xf32>
    %72 = arith.subf %70, %71 : vector<8x1xf32>
    %cst_29 = arith.constant 0.000000e+00 : f32
    %73 = vector.broadcast %cst_29 : f32 to vector<8x1xf32>
    %74 = arith.maximumf %72, %73 : vector<8x1xf32>
    %75 = vector.broadcast %65 : vector<8x1xf32> to vector<8x512xf32>
    %76 = arith.subf %61, %75 : vector<8x512xf32>
    %cst_30 = arith.constant 9.99999974E-6 : f32
    %77 = vector.broadcast %cst_30 : f32 to vector<8x1xf32>
    %78 = arith.addf %74, %77 : vector<8x1xf32>
    %79 = math.rsqrt %78 : vector<8x1xf32>
    %80 = vector.broadcast %79 : vector<8x1xf32> to vector<8x512xf32>
    %81 = arith.mulf %76, %80 : vector<8x512xf32>
    %82 = vector.broadcast %52 : vector<1x512xf32> to vector<8x512xf32>
    %83 = arith.mulf %81, %82 : vector<8x512xf32>
    %84 = vector.broadcast %53 : vector<1x512xf32> to vector<8x512xf32>
    %85 = arith.addf %83, %84 : vector<8x512xf32>
    %86 = arith.truncf %85 : vector<8x512xf32> to vector<8x512xbf16>
    %c0_31 = arith.constant 0 : index
    %c0_32 = arith.constant 0 : index
    %87 = vector.load %arg6[%c0_31, %c0_32] : memref<8x512xbf16, #tpu.memory_space<vmem>>, vector<8x512xbf16>
    tpu.vector_store %arg6[%c0_31, %c0_32], %86 {strides = array<i32>} : memref<8x512xbf16, #tpu.memory_space<vmem>>, vector<8x512xbf16>,
    return
  }
  func.func @transform_0(%arg0: i32) -> (i32, i32, i32) {
    %c0_i32 = arith.constant 0 : i32
    %c0_i32_0 = arith.constant 0 : i32
    %c0_i32_1 = arith.constant 0 : i32
    %c0_i32_2 = arith.constant 0 : i32
    return %c0_i32, %c0_i32_0, %c0_i32_1 : i32, i32, i32
  }
  func.func @transform_1(%arg0: i32) -> (i32, i32) {
    %c0_i32 = arith.constant 0 : i32
    %c0_i32_0 = arith.constant 0 : i32
    %c0_i32_1 = arith.constant 0 : i32
    return %c0_i32, %c0_i32_0 : i32, i32
  }
  func.func @transform_2(%arg0: i32) -> (i32, i32) {
    %c0_i32 = arith.constant 0 : i32
    %c0_i32_0 = arith.constant 0 : i32
    %c0_i32_1 = arith.constant 0 : i32
    return %c0_i32, %c0_i32_0 : i32, i32
  }
  func.func @transform_3(%arg0: i32) -> (i32, i32) {
    %c0_i32 = arith.constant 0 : i32
    %c0_i32_0 = arith.constant 0 : i32
    %c0_i32_1 = arith.constant 0 : i32
    return %c0_i32, %c0_i32_0 : i32, i32
  }
  func.func @transform_4(%arg0: i32) -> (i32, i32) {
    %c0_i32 = arith.constant 0 : i32
    %c0_i32_0 = arith.constant 0 : i32
    %c0_i32_1 = arith.constant 0 : i32
    return %c0_i32, %c0_i32_0 : i32, i32
  }
  func.func @transform_5(%arg0: i32) -> (i32, i32) {
    %c0_i32 = arith.constant 0 : i32
    %c0_i32_0 = arith.constant 0 : i32
    %c0_i32_1 = arith.constant 0 : i32
    return %c0_i32, %c0_i32_0 : i32, i32
  }
}

</mosaic_0001>

<bundles_post_ra>
// kernel: tpu_custom_call.1
= control target key start
LH: loop header
LB: loop body
LE: loop exit
PB: predicated region body
PF: predicated region fallthrough
CT: control target
= control target key end

     0   :  { %10 = vsyncpa [#allocation3], 0  ;;  %s3825_s0 = inlined_call_operand.hbm [shape: f32[8,4,256], index: 0, kind: input, shape index: {}]   ;;  %s3826_s1 = inlined_call_operand.hbm [shape: bf16[4,1024], index: 1, kind: input, shape index: {}]   ;;  %s3827_s2 = inlined_call_operand.hbm [shape: f32[8,1024], index: 2, kind: input, shape index: {}]   ;;  %s3828_s3 = inlined_call_operand.hbm [shape: bf16[1024,512], index: 3, kind: input, shape index: {}]   ;;  %s3829_s4 = inlined_call_operand.hbm [shape: f32[8,512], index: 4, kind: input, shape index: {}]   ;;  %s3830_s5 = inlined_call_operand.hbm [shape: bf16[8,512], index: 5, kind: output, shape index: {}]  }
   0x1   :  { %11 = vsyncpa [#allocation6], 0 }
   0x2   :  { %12 = vsyncpa [#allocation9], 0 }
   0x3   :  { %13 = vsyncpa [#allocation4], 0  ;;  %s3527_s18 = smov [#allocation5]   ;;  %s3528_s20 = smov [#allocation8]  }
   0x4   :  { %s32_s19 = sshll.u32 %s3527_s18, 4  ;;  %s51_s21 = sshll.u32 %s3528_s20, 4  ;;  %s33_s19 = int_to_ptr.vmem [resolvable:$true] %s32_s19  ;;  %s52_s21 = int_to_ptr.vmem [resolvable:$true] %s51_s21 }
   0x5   :  { %s3407_s22 = scalar_lea.vmem %s33_s19, 256  ;;  %p3412_p1 = scmp.lt.s32.totalorder %s33_s19, %s33_s19 }
   0x6   :  { %p3408_p0 = scmp.ne.s32.totalorder %s33_s19, %s3407_s22  ;;  %p3413_p2 = scmp.lt.s32.totalorder %s3407_s22, %s3407_s22 }
   0x8   :  { %p3414_p3 = por %p3413_p2, %p3412_p1 }
   0xa   :  { %p3415_p4 = pnand %p3414_p3, %p3408_p0 }
   0xc   :  { %3418 = shalt.err (!%p3415_p4)
}
   0xd   :  { %35 = dma.hbm_to_vmem [thread:$0]  %s3826_s1, 256, %s33_s19, [#allocation6]  }
   0xe   :  { %s3427_s25 = scalar_lea.vmem %s52_s21, 32768  ;;  %p3432_p6 = scmp.lt.s32.totalorder %s52_s21, %s52_s21 }
   0xf   :  { %p3428_p5 = scmp.ne.s32.totalorder %s52_s21, %s3427_s25  ;;  %p3433_p7 = scmp.lt.s32.totalorder %s3427_s25, %s3427_s25 }
  0x11   :  { %p3434_p8 = por %p3433_p7, %p3432_p6 }
  0x13   :  { %p3435_p9 = pnand %p3434_p8, %p3428_p5 }
  0x15   :  { %3438 = shalt.err (!%p3435_p9)
}
  0x16   :  { %s3529_s26 = smov 256   ;;  %s3530_s27 = smov 16  }
  0x17   :  { %57 = dma.hbm_to_vmem [thread:$0]  %s3828_s3, 32768, %s52_s21, [#allocation9], %s3529_s26, %s3529_s26, %s3530_s27  }
  0x18   :  { %s3531_s30 = smov [#allocation2]  }
  0x19   :  { %s19_s6 = sshll.u32 %s3531_s30, 4  ;;  %s20_s6 = int_to_ptr.vmem [resolvable:$true] %s19_s6 }
  0x1a   :  { %s3447_s7 = scalar_lea.vmem %s20_s6, 1024  ;;  %p3452_p11 = scmp.lt.s32.totalorder %s20_s6, %s20_s6 }
  0x1b   :  { %p3448_p10 = scmp.ne.s32.totalorder %s20_s6, %s3447_s7  ;;  %p3453_p12 = scmp.lt.s32.totalorder %s3447_s7, %s3447_s7 }
  0x1d   :  { %p3454_p13 = por %p3453_p12, %p3452_p11 }
  0x1f   :  { %p3455_p0 = pnand %p3454_p13, %p3448_p10 }
  0x21   :  { %3458 = shalt.err (!%p3455_p0)
}
  0x22   :  { %s3532_s1 = smov 128   ;;  %s3533_s8 = smov 8  }
  0x23   :  { %25 = dma.hbm_to_vmem [thread:$0]  %s3825_s0, 1024, %s20_s6, [#allocation3], %s3532_s1, %s3532_s1, %s3533_s8  }
  0x24   :  { %s3534_s11 = smov [#allocation7]   ;;  %s3535_s3 = smov [#allocation10]  }
  0x25   :  { %s42_s12 = sshll.u32 %s3534_s11, 4  ;;  %s64_s13 = sshll.u32 %s3535_s3, 4  ;;  %s43_s12 = int_to_ptr.vmem [resolvable:$true] %s42_s12  ;;  %s65_s13 = int_to_ptr.vmem [resolvable:$true] %s64_s13 }
  0x26   :  { %s3467_s14 = scalar_lea.vmem %s43_s12, 1024  ;;  %p3472_p2 = scmp.lt.s32.totalorder %s43_s12, %s43_s12 }
  0x27   :  { %p3468_p1 = scmp.ne.s32.totalorder %s43_s12, %s3467_s14  ;;  %p3473_p3 = scmp.lt.s32.totalorder %s3467_s14, %s3467_s14 }
  0x29   :  { %p3474_p4 = por %p3473_p3, %p3472_p2 }
  0x2b   :  { %p3475_p5 = pnand %p3474_p4, %p3468_p1 }
  0x2d   :  { %3478 = shalt.err (!%p3475_p5)
}
  0x2e   :  { %45 = dma.hbm_to_vmem [thread:$0]  %s3827_s2, 1024, %s43_s12, [#allocation6]  }
  0x2f   :  { %s3487_s17 = scalar_lea.vmem %s65_s13, 512  ;;  %p3492_p7 = scmp.lt.s32.totalorder %s65_s13, %s65_s13 }
  0x30   :  { %p3488_p6 = scmp.ne.s32.totalorder %s65_s13, %s3487_s17  ;;  %p3493_p8 = scmp.lt.s32.totalorder %s3487_s17, %s3487_s17 }
  0x32   :  { %p3494_p9 = por %p3493_p8, %p3492_p7 }
  0x34   :  { %p3495_p10 = pnand %p3494_p9, %p3488_p6 }
  0x36   :  { %3498 = shalt.err (!%p3495_p10)
}
  0x37   :  { %67 = dma.hbm_to_vmem [thread:$0]  %s3829_s4, 512, %s65_s13, [#allocation9]  }
  0x38   :  { %3519 = dma.done.wait [#allocation3], 1024  }
  0x39   :  { %3520 = vsyncadd [#allocation3], 4294966272 }
  0x3a   :  { %3521 = dma.done.wait [#allocation6], 1280  }
  0x3b   :  { %3522 = vsyncadd [#allocation6], 4294966016 }
  0x3c   :  { %3523 = dma.done.wait [#allocation9], 33280  }
  0x3d   :  { %3524 = vsyncadd [#allocation9], 4294934016  ;;  %v184_v0 = vlaneseq  ;;  %vm116_vm0 = vcmask 1043456   ;;  %v84_v4 = vld [vmem:[#allocation2] sm:$0xff]  ;;  %v86_v5 = vld [vmem:[#allocation2 + $0x10] sm:$0xff]  ;;  %vm321_vm1 = vcmask 1041408  }
  0x3e   :  { %v85_v6 = vld [vmem:[#allocation2 + $0x8] sm:$0xff]  ;;  %v100_v7 = vcombine.high %v84_v4, %v84_v4  ;;  %v117_v8 = vsel %vm116_vm0, %v84_v4, 0.0  ;;  %v102_v9 = vcombine.high %v86_v5, %v86_v5  ;;  %v127_v10 = vsel %vm116_vm0, %v86_v5, 0.0  ;;  %v87_v11 = vld [vmem:[#allocation2 + $0x18] sm:$0xff]  ;;  %v88_v12 = vld [vmem:[#allocation2 + $0x20] sm:$0xff]  ;;  %s3538_s2 = smov [#allocation11]  }
  0x3f   :  { %v3584_v1 = vshrl.u32 %v184_v0, 7  ;;  %v233_v2 = vand.u32 127, %v184_v0  ;;  %v89_v13 = vld [vmem:[#allocation2 + $0x28] sm:$0xff]  ;;  %v101_v14 = vcombine.high %v85_v6, %v85_v6  ;;  %v122_v15 = vsel %vm116_vm0, %v85_v6, 0.0  ;;  %v90_v17 = vld [vmem:[#allocation2 + $0x30] sm:$0xff]  ;;  %v91_v18 = vld [vmem:[#allocation2 + $0x38] sm:$0xff] }
  0x40   :  { %v103_v16 = vcombine.high %v87_v11, %v87_v11  ;;  %v118_v19 = vsel %vm116_vm0, %v100_v7, 0.0  ;;  %v128_v20 = vsel %vm116_vm0, %v102_v9, 0.0  ;;  %v132_v21 = vsel %vm116_vm0, %v87_v11, 0.0  ;;  %v174_v47 = vld [vmem:[#allocation5] sm:$0xff]  ;;  %v175_v56 = vld [vmem:[#allocation5 + $0x8] sm:$0xff]  ;;  %s2686_s4 = sshll.u32 %s3538_s2, 4  ;;  %s2687_s4 = int_to_ptr.vmem [resolvable:$true] %s2686_s4 }
  0x41   :  { %v3587_v3 = vsub.s32 %v233_v2, %v3584_v1  ;;  %v104_v22 = vcombine.high %v88_v12, %v88_v12  ;;  %v119_v23 = vadd.f32 %v118_v19, %v117_v8  ;;  %v129_v24 = vadd.f32 %v128_v20, %v127_v10  ;;  %s3499_s19 = scalar_lea.vmem %s2687_s4, 256  ;;  %p3504_p12 = scmp.lt.s32.totalorder %s2687_s4, %s2687_s4 }
  0x42   :  { %v123_v25 = vsel %vm116_vm0, %v101_v14, 0.0  ;;  %v133_v26 = vsel %vm116_vm0, %v103_v16, 0.0  ;;  %v105_v27 = vcombine.high %v89_v13, %v89_v13  ;;  %v137_v30 = vsel %vm116_vm0, %v88_v12, 0.0  ;;  %p3500_p11 = scmp.ne.s32.totalorder %s2687_s4, %s3499_s19  ;;  %p3505_p13 = scmp.lt.s32.totalorder %s3499_s19, %s3499_s19 }
  0x43   :  { %120 = vadd.xlane.f32.xlu0 %v119_v23  ;;  %130 = vadd.xlane.f32.xlu1 %v129_v24  ;;  %v124_v28 = vadd.f32 %v123_v25, %v122_v15  ;;  %v134_v29 = vadd.f32 %v133_v26, %v132_v21  ;;  %v138_v31 = vsel %vm116_vm0, %v104_v22, 0.0  ;;  %v142_v32 = vsel %vm116_vm0, %v89_v13, 0.0 }
  0x44   :  { %v143_v33 = vsel %vm116_vm0, %v105_v27, 0.0  ;;  %v106_v34 = vcombine.high %v90_v17, %v90_v17  ;;  %v107_v35 = vcombine.high %v91_v18, %v91_v18  ;;  %v139_v36 = vadd.f32 %v138_v31, %v137_v30  ;;  %p3506_p0 = por %p3505_p13, %p3504_p12 }
  0x45   :  { %v144_v37 = vadd.f32 %v143_v33, %v142_v32  ;;  %v147_v38 = vsel %vm116_vm0, %v90_v17, 0.0  ;;  %v152_v40 = vsel %vm116_vm0, %v91_v18, 0.0  ;;  %v3536_v44 = vmov 1983009808  }
  0x46   :  { %v148_v39 = vsel %vm116_vm0, %v106_v34, 0.0  ;;  %v153_v41 = vsel %vm116_vm0, %v107_v35, 0.0  ;;  %v285_v45 = vunpack.c.l.s4 %v3536_v44  ;;  %v283_v49 = vcombine.high %v174_v47, %v174_v47  ;;  %p3507_p1 = pnand %p3506_p0, %p3500_p11 }
  0x47   :  { %125 = vadd.xlane.f32.xlu0 %v124_v28  ;;  %135 = vadd.xlane.f32.xlu1 %v134_v29  ;;  %v149_v42 = vadd.f32 %v148_v39, %v147_v38  ;;  %v154_v43 = vadd.f32 %v153_v41, %v152_v40  ;;  %v3537_v58 = vmov 0   ;;  %v300_v59 = vcombine.high %v175_v56, %v175_v56 }
  0x48   :  { %v286_v46 = vunpack.c.0.s8 %v285_v45  ;;  %378 = vmatprep.mubr.bf16.mxu0 %v3537_v58  ;;  %419 = vmatprep.mubr.bf16.mxu1 %v3537_v58  ;;  %vm266_vm2 = vcmask 1041409   ;;  %vm268_vm3 = vcmask 1042434   ;;  %vm270_vm4 = vcmask 1043459  }
  0x49   :  { %vm272_vm5 = vcmask 1044484   ;;  %vm274_vm6 = vcmask 1045509   ;;  %vm276_vm7 = vcmask 1046534   ;;  %vm278_vm8 = vcmask 1047559  }
  0x4a   :  { %v289_v48 = vsub.s32 %v286_v46, %v3584_v1  ;;  %vm317_vm9 = vcmask 31744  }
  0x4b   :  { %140 = vadd.xlane.f32.xlu0 %v139_v36  ;;  %145 = vadd.xlane.f32.xlu1 %v144_v37 }
  0x4c   :  { %v290_v50 = vrot.slane %v174_v47, %v289_v48  ;;  %v297_v51 = vrot.slane %v283_v49, %v289_v48  ;;  %v307_v57 = vrot.slane %v175_v56, %v289_v48  ;;  %v314_v62 = vrot.slane %v300_v59, %v289_v48  ;;  %v2993_v56 = vld [vmem:[#allocation8 + $0xc0] ss:$16 sps:$4 sm:$0xff]   ;;  %v3001_v59 = vld [vmem:[#allocation8 + $0xa4] ss:$16 sps:$4 sm:$0xff]  }
  0x4e   :  { %v298_v52 = vcombine.high %v290_v50, %v290_v50  ;;  %v299_v53 = vcombine.high %v297_v51, %v297_v51  ;;  %v323_v54 = vsel %vm321_vm1, %v290_v50, 0  ;;  %v329_v55 = vsel %vm321_vm1, %v297_v51, 0  ;;  %v2987_v51 = vld [vmem:[#allocation8 + $0xe0] ss:$16 sps:$4 sm:$0xff]  }
  0x4f   :  { %150 = vadd.xlane.f32.xlu0 %v149_v42  ;;  %155 = vadd.xlane.f32.xlu1 %v154_v43  ;;  %v315_v60 = vcombine.high %v307_v57, %v307_v57  ;;  %v3613_v61 = vsel %vm321_vm1, %v307_v57, 0  ;;  %v316_v63 = vcombine.high %v314_v62, %v314_v62  ;;  %v341_v0 = vsel %vm321_vm1, %v314_v62, 0  ;;  %v2996_v57 = vld [vmem:[#allocation8 + $0x2c0] ss:$16 sps:$4 sm:$0xff]   ;;  %v3007_v62 = vld [vmem:[#allocation8 + $0x84] ss:$16 sps:$4 sm:$0xff]  }
  0x50   :  { %2697 = vmatprep.subr.msk.bf16.mxu0 %vm321_vm1, %v298_v52  ;;  %2699 = vmatprep.subr.msk.bf16.mxu1 %vm321_vm1, %v299_v53  ;;  %v2989_v52 = vld [vmem:[#allocation8 + $0xe4] ss:$16 sps:$4 sm:$0xff]   ;;  %v2990_v53 = vld [vmem:[#allocation8 + $0x2e0] ss:$16 sps:$4 sm:$0xff]  }
  0x51   :  { %361 = vmatpush1.bf16.msra.mxu0 %v323_v54  ;;  %402 = vmatpush1.bf16.msra.mxu1 %v329_v55  ;;  %v2992_v54 = vld [vmem:[#allocation8 + $0x2e4] ss:$16 sps:$4 sm:$0xff]  }
  0x52   :  { %2701 = vmatprep.subr.msk.bf16.mxu0 %vm321_vm1, %v315_v60  ;;  %2703 = vmatprep.subr.msk.bf16.mxu1 %vm321_vm1, %v316_v63  ;;  %v2998_v55 = vld [vmem:[#allocation8 + $0x2c4] ss:$16 sps:$4 sm:$0xff]  }
  0x53   :  { %v3004_v60 = vld [vmem:[#allocation8 + $0x2a4] ss:$16 sps:$4 sm:$0xff]  }
  0x54   :  { %v3010_v63 = vld [vmem:[#allocation8 + $0x284] ss:$16 sps:$4 sm:$0xff]  }
  0xcc   :  { %v121_v2 = vpop.xlane.xlu0 %120  ;;  %v131_v4 = vpop.xlane.xlu1 %130 }
  0xcd   :  { %v158_v5 = vmul.f32 0.00390625, %v121_v2  ;;  %v160_v6 = vmul.f32 0.00390625, %v131_v4  ;;  %v3008_v2 = vld [vmem:[#allocation8 + $0x280] ss:$16 sps:$4 sm:$0xff]   ;;  %v3013_v4 = vld [vmem:[#allocation8 + $0x64] ss:$16 sps:$4 sm:$0xff]  }
  0xcf   :  { %v176_v7 = vpack.c.bf16 %v158_v5, %v158_v5  ;;  %v178_v8 = vpack.c.bf16 %v160_v6, %v160_v6  ;;  %v3016_v5 = vld [vmem:[#allocation8 + $0x264] ss:$16 sps:$4 sm:$0xff]   ;;  %v3011_v6 = vld [vmem:[#allocation8 + $0x60] ss:$16 sps:$4 sm:$0xff]  }
  0xd0   :  { %v126_v9 = vpop.xlane.xlu0 %125  ;;  %v136_v10 = vpop.xlane.xlu1 %135 }
  0xd1   :  { %v159_v11 = vmul.f32 0.00390625, %v126_v9  ;;  %v161_v12 = vmul.f32 0.00390625, %v136_v10  ;;  %v224_v13 = vunpack.c.l.b16 %v176_v7  ;;  %v226_v16 = vunpack.c.l.b16 %v178_v8  ;;  %v3014_v7 = vld [vmem:[#allocation8 + $0x260] ss:$16 sps:$4 sm:$0xff]   ;;  %v3019_v8 = vld [vmem:[#allocation8 + $0x44] ss:$16 sps:$4 sm:$0xff]  }
  0xd2   :  { %v3022_v9 = vld [vmem:[#allocation8 + $0x244] ss:$16 sps:$4 sm:$0xff]   ;;  %v3017_v10 = vld [vmem:[#allocation8 + $0x40] ss:$16 sps:$4 sm:$0xff]  }
  0xd3   :  { %v177_v14 = vpack.c.bf16 %v159_v11, %v159_v11  ;;  %v179_v15 = vpack.c.bf16 %v161_v12, %v161_v12  ;;  %v237_v23 = vrot.slane %v224_v13, %v3587_v3  ;;  %v245_v28 = vrot.slane %v226_v16, %v3587_v3  ;;  %v3020_v11 = vld [vmem:[#allocation8 + $0x240] ss:$16 sps:$4 sm:$0xff]   ;;  %v3025_v12 = vld [vmem:[#allocation8 + $0x24] ss:$16 sps:$4 sm:$0xff]  }
  0xd4   :  { %v141_v17 = vpop.xlane.xlu0 %140  ;;  %v146_v18 = vpop.xlane.xlu1 %145  ;;  %v3028_v13 = vld [vmem:[#allocation8 + $0x224] ss:$16 sps:$4 sm:$0xff]  }
  0xd5   :  { %v225_v19 = vunpack.c.l.b16 %v177_v14  ;;  %v227_v20 = vunpack.c.l.b16 %v179_v15  ;;  %v162_v21 = vmul.f32 0.00390625, %v141_v17  ;;  %v163_v22 = vmul.f32 0.00390625, %v146_v18  ;;  %v3023_v14 = vld [vmem:[#allocation8 + $0x20] ss:$16 sps:$4 sm:$0xff]   ;;  %v3031_v16 = vld [vmem:[#allocation8 + $0x4] ss:$16 sps:$4 sm:$0xff]  }
  0xd6   :  { %v3026_v15 = vld [vmem:[#allocation8 + $0x220] ss:$16 sps:$4 sm:$0xff]   ;;  %v3034_v17 = vld [vmem:[#allocation8 + $0x204] ss:$16 sps:$4 sm:$0xff]  }
  0xd7   :  { %v241_v24 = vrot.slane %v225_v19, %v3587_v3  ;;  %v249_v25 = vrot.slane %v227_v20, %v3587_v3  ;;  %v180_v26 = vpack.c.bf16 %v162_v21, %v162_v21  ;;  %v181_v27 = vpack.c.bf16 %v163_v22, %v163_v22  ;;  %v3029_v18 = vld [vmem:[#allocation8] ss:$16 sps:$4 sm:$0xff]  }
  0xd8   :  { %v151_v29 = vpop.xlane.xlu0 %150  ;;  %v156_v30 = vpop.xlane.xlu1 %155  ;;  %v3032_v19 = vld [vmem:[#allocation8 + $0x200] ss:$16 sps:$4 sm:$0xff]   ;;  %v3630_v20 = vsub.s32 0, %v3584_v1 }
  0xd9   :  { %v267_v31 = vsel %vm266_vm2, %v241_v24, %v237_v23  ;;  %v228_v32 = vunpack.c.l.b16 %v180_v26  ;;  %v229_v33 = vunpack.c.l.b16 %v181_v27  ;;  %v164_v34 = vmul.f32 0.00390625, %v151_v29  ;;  %v3632_v21 = vld [vmem:[#allocation7] sm:$0xff]  ;;  %v3634_v22 = vld [vmem:[#allocation7 + $0x10] sm:$0xff]  ;;  %v3642_v26 = vld [vmem:[#allocation7 + $0x18] sm:$0xff] }
  0xda   :  { %v269_v35 = vsel %vm268_vm3, %v245_v28, %v267_v31  ;;  %v165_v36 = vmul.f32 0.00390625, %v156_v30  ;;  %v187_v23 = vrot.slane %v3632_v21, %v3630_v20  ;;  %v195_v24 = vrot.slane %v3634_v22, %v3630_v20 }
  0xdb   :  { %v271_v37 = vsel %vm270_vm4, %v249_v25, %v269_v35  ;;  %v253_v38 = vrot.slane %v228_v32, %v3587_v3  ;;  %v182_v39 = vpack.c.bf16 %v164_v34, %v164_v34  ;;  %v257_v40 = vrot.slane %v229_v33, %v3587_v3  ;;  %v3640_v25 = vld [vmem:[#allocation7 + $0x8] sm:$0xff]  ;;  %v3648_v35 = vld [vmem:[#allocation7 + $0x20] sm:$0xff] }
  0xdc   :  { %v183_v41 = vpack.c.bf16 %v165_v36, %v165_v36  ;;  %v191_v29 = vrot.slane %v3640_v25, %v3630_v20  ;;  %v199_v30 = vrot.slane %v3642_v26, %v3630_v20  ;;  %v3650_v36 = vld [vmem:[#allocation7 + $0x30] sm:$0xff] }
  0xdd   :  { %v273_v42 = vsel %vm272_vm5, %v253_v38, %v271_v37  ;;  %v230_v43 = vunpack.c.l.b16 %v182_v39 }
  0xde   :  { %v231_v44 = vunpack.c.l.b16 %v183_v41  ;;  %v275_v46 = vsel %vm274_vm6, %v257_v40, %v273_v42 }
  0xdf   :  { %v261_v45 = vrot.slane %v230_v43, %v3587_v3  ;;  %v203_v43 = vrot.slane %v3648_v35, %v3630_v20 }
  0xe0   :  { %v265_v47 = vrot.slane %v231_v44, %v3587_v3  ;;  %v2995_v3 = vld [vmem:[#allocation8 + $0xc4] ss:$16 sps:$4 sm:$0xff]   ;;  %v211_v44 = vrot.slane %v3650_v36, %v3630_v20 }
  0xe1   :  { %v277_v48 = vsel %vm276_vm7, %v261_v45, %v275_v46  ;;  %v3656_v45 = vld [vmem:[#allocation7 + $0x28] sm:$0xff]  ;;  %v3658_v46 = vld [vmem:[#allocation7 + $0x38] sm:$0xff] }
  0xe2   :  { %v279_v49 = vsel %vm278_vm8, %v265_v47, %v277_v48 }
  0xe3   :  { %v280_v50 = vpack.c.b16 %v279_v49, %v279_v49 }
  0xe5   :  { %2698 = vmatmul.mubr.msk.bf16.vlgmr.msra.gmra.mxu0 %vm317_vm9, %v280_v50  ;;  %2700 = vmatmul.mubr.msk.bf16.vlgmr.msra.gmra.mxu1 %vm317_vm9, %v280_v50 }
  0xe6   :  { %443 = vmatpush1.bf16.msra.mxu0 %v3613_v61  ;;  %484 = vmatpush1.bf16.msra.mxu1 %v341_v0  ;;  %v3002_v61 = vld [vmem:[#allocation8 + $0x2a0] ss:$16 sps:$4 sm:$0xff]  }
  0xe7   :  { %460 = vmatprep.mubr.bf16.mxu0 %v3537_v58  ;;  %501 = vmatprep.mubr.bf16.mxu1 %v3537_v58  ;;  %v2999_v58 = vld [vmem:[#allocation8 + $0xa0] ss:$16 sps:$4 sm:$0xff]  }
  0xe8   :  { %2244 = vmatprep.subr.bf16.mxu0 %v2989_v52  ;;  %2285 = vmatprep.subr.bf16.mxu1 %v2992_v54  ;;  %v3005_v0 = vld [vmem:[#allocation8 + $0x80] ss:$16 sps:$4 sm:$0xff]   ;;  %v215_v54 = vrot.slane %v3658_v46, %v3630_v20 }
  0xed   :  { %2702 = vmatmul.mubr.msk.bf16.vlgmr.msra.gmra.mxu0 %vm317_vm9, %v280_v50  ;;  %2704 = vmatmul.mubr.msk.bf16.vlgmr.msra.gmra.mxu1 %vm317_vm9, %v280_v50 }
  0xee   :  { %2245 = vmatpush1.bf16.msra.mxu0 %v2987_v51  ;;  %2286 = vmatpush1.bf16.msra.mxu1 %v2990_v53  ;;  %v207_v53 = vrot.slane %v3656_v45, %v3630_v20 }
  0xef   :  { %2246 = vmatprep.subr.bf16.mxu0 %v2995_v3  ;;  %2287 = vmatprep.subr.bf16.mxu1 %v2998_v55 }
  0xf2   :  { %2247 = vmatpush1.bf16.msra.mxu0 %v2993_v56  ;;  %2288 = vmatpush1.bf16.msra.mxu1 %v2996_v57 }
  0xf3   :  { %2248 = vmatprep.subr.bf16.mxu0 %v3001_v59  ;;  %2289 = vmatprep.subr.bf16.mxu1 %v3004_v60 }
  0xf6   :  { %2249 = vmatpush1.bf16.msra.mxu0 %v2999_v58  ;;  %2290 = vmatpush1.bf16.msra.mxu1 %v3002_v61 }
  0xf7   :  { %2250 = vmatprep.subr.bf16.mxu0 %v3007_v62  ;;  %2291 = vmatprep.subr.bf16.mxu1 %v3010_v63 }
  0xfa   :  { %2251 = vmatpush1.bf16.msra.mxu0 %v3005_v0  ;;  %2292 = vmatpush1.bf16.msra.mxu1 %v3008_v2 }
  0xfb   :  { %2252 = vmatprep.subr.bf16.mxu0 %v3013_v4  ;;  %2293 = vmatprep.subr.bf16.mxu1 %v3016_v5 }
  0xfe   :  { %2253 = vmatpush1.bf16.msra.mxu0 %v3011_v6  ;;  %2294 = vmatpush1.bf16.msra.mxu1 %v3014_v7 }
  0xff   :  { %2254 = vmatprep.subr.bf16.mxu0 %v3019_v8  ;;  %2295 = vmatprep.subr.bf16.mxu1 %v3022_v9 }
 0x102   :  { %2255 = vmatpush1.bf16.msra.mxu0 %v3017_v10  ;;  %2296 = vmatpush1.bf16.msra.mxu1 %v3020_v11 }
 0x103   :  { %2256 = vmatprep.subr.bf16.mxu0 %v3025_v12  ;;  %2297 = vmatprep.subr.bf16.mxu1 %v3028_v13 }
 0x106   :  { %2257 = vmatpush1.bf16.msra.mxu0 %v3023_v14  ;;  %2298 = vmatpush1.bf16.msra.mxu1 %v3026_v15 }
 0x107   :  { %2258 = vmatprep.subr.bf16.mxu0 %v3031_v16  ;;  %2299 = vmatprep.subr.bf16.mxu1 %v3034_v17 }
 0x10a   :  { %2259 = vmatpush1.bf16.msra.mxu0 %v3029_v18  ;;  %2300 = vmatpush1.bf16.msra.mxu1 %v3032_v19 }
 0x1a5   :  { %v380_v27 = vpop.f32.mrf.mxu0  ;;  %v421_v28 = vpop.f32.mrf.mxu1 }
 0x1a6   :  { %v381_v31 = vadd.f32 %v380_v27, %v187_v23  ;;  %v422_v32 = vadd.f32 %v421_v28, %v195_v24 }
 0x1a7   :  { %v382_v33 = vpop.f32.mrf.mxu0  ;;  %v423_v34 = vpop.f32.mrf.mxu1 }
 0x1a8   :  { %v518_v37 = vmul.f32 0.70710677, %v381_v31  ;;  %v520_v38 = vmul.f32 0.70710677, %v422_v32  ;;  %v383_v39 = vadd.f32 %v382_v33, %v191_v29  ;;  %v424_v40 = vadd.f32 %v423_v34, %v199_v30 }
 0x1a9   :  { %v384_v41 = vpop.f32.mrf.mxu0  ;;  %v425_v42 = vpop.f32.mrf.mxu1  ;;  %v510_v9 = vmul.f32 0.5, %v381_v31  ;;  %v512_v14 = vmul.f32 0.5, %v422_v32 }
 0x1aa   :  { %3371 = verf.f32 %v518_v37  ;;  %v519_v47 = vmul.f32 0.70710677, %v383_v39  ;;  %v521_v50 = vmul.f32 0.70710677, %v424_v40  ;;  %v511_v15 = vmul.f32 0.5, %v383_v39 }
 0x1ab   :  { %3373 = verf.f32 %v520_v38  ;;  %v385_v48 = vpop.f32.mrf.mxu0  ;;  %v426_v49 = vpop.f32.mrf.mxu1  ;;  %v513_v23 = vmul.f32 0.5, %v424_v40 }
 0x1ac   :  { %3375 = verf.f32 %v519_v47 }
 0x1ad   :  { %v462_v51 = vpop.f32.mrf.mxu0  ;;  %v503_v52 = vpop.f32.mrf.mxu1  ;;  %3377 = verf.f32 %v521_v50 }
 0x1ae   :  { %v463_v3 = vadd.f32 %v462_v51, %v203_v43  ;;  %v504_v55 = vadd.f32 %v503_v52, %v211_v44 }
 0x1af   :  { %v464_v56 = vpop.f32.mrf.mxu0  ;;  %v505_v57 = vpop.f32.mrf.mxu1 }
 0x1b0   :  { %v522_v59 = vmul.f32 0.70710677, %v463_v3  ;;  %v524_v60 = vmul.f32 0.70710677, %v504_v55  ;;  %v465_v58 = vadd.f32 %v464_v56, %v207_v53  ;;  %v506_v61 = vadd.f32 %v505_v57, %v215_v54 }
 0x1b1   :  { %v466_v62 = vpop.f32.mrf.mxu0  ;;  %v507_v63 = vpop.f32.mrf.mxu1  ;;  %v514_v32 = vmul.f32 0.5, %v463_v3  ;;  %v516_v42 = vmul.f32 0.5, %v504_v55 }
 0x1b2   :  { %3379 = verf.f32 %v522_v59  ;;  %v523_v0 = vmul.f32 0.70710677, %v465_v58  ;;  %v525_v5 = vmul.f32 0.70710677, %v506_v61  ;;  %v515_v43 = vmul.f32 0.5, %v465_v58 }
 0x1b3   :  { %3381 = verf.f32 %v524_v60  ;;  %v467_v2 = vpop.f32.mrf.mxu0  ;;  %v508_v4 = vpop.f32.mrf.mxu1  ;;  %v517_v52 = vmul.f32 0.5, %v506_v61 }
 0x1b4   :  { %3383 = verf.f32 %v523_v0 }
 0x1b5   :  { %3385 = verf.f32 %v525_v5 }
 0x1b7   :  { %v3372_v6 = vpop.eup %3371 }
 0x1b8   :  { %v3374_v7 = vpop.eup %3373  ;;  %v534_v8 = vadd.f32 1.0, %v3372_v6  ;;  %v3037_v6 = vld [vmem:[#allocation8 + $0x1e4] ss:$16 sps:$4 sm:$0xff]  }
 0x1b9   :  { %v536_v10 = vadd.f32 1.0, %v3374_v7  ;;  %v3376_v11 = vpop.eup %3375  ;;  %v3040_v7 = vld [vmem:[#allocation8 + $0x3e4] ss:$16 sps:$4 sm:$0xff]   ;;  %2260 = vmatprep.subr.bf16.mxu0 %v3037_v6 }
 0x1ba   :  { %v3378_v12 = vpop.eup %3377  ;;  %v3664_v13 = vmul.f32 %v534_v8, %v510_v9  ;;  %v535_v16 = vadd.f32 1.0, %v3376_v11  ;;  %v3035_v8 = vld [vmem:[#allocation8 + $0x1e0] ss:$16 sps:$4 sm:$0xff]   ;;  %2301 = vmatprep.subr.bf16.mxu1 %v3040_v7  ;;  %v3046_v11 = vld [vmem:[#allocation8 + $0x3c4] ss:$16 sps:$4 sm:$0xff]  }
 0x1bb   :  { %v537_v17 = vadd.f32 1.0, %v3378_v12  ;;  %v3666_v18 = vmul.f32 %v536_v10, %v512_v14  ;;  %v3038_v9 = vld [vmem:[#allocation8 + $0x3e0] ss:$16 sps:$4 sm:$0xff]   ;;  %2261 = vmatpush2.bf16.msra.mxu0 %v3035_v8  ;;  %v3043_v10 = vld [vmem:[#allocation8 + $0x1c4] ss:$16 sps:$4 sm:$0xff]  }
 0x1bc   :  { %v3668_v19 = vmul.f32 %v535_v16, %v511_v15  ;;  %v561_v27 = vmul.f32 %v3664_v13, %v3664_v13  ;;  %2302 = vmatpush2.bf16.msra.mxu1 %v3038_v9  ;;  %v3041_v12 = vld [vmem:[#allocation8 + $0x1c0] ss:$16 sps:$4 sm:$0xff]   ;;  %2262 = vmatprep.subr.bf16.mxu0 %v3043_v10  ;;  %v3049_v15 = vld [vmem:[#allocation8 + $0x1a4] ss:$16 sps:$4 sm:$0xff]  }
 0x1bd   :  { %v3676_v30 = vmul.f32 %v537_v17, %v513_v23  ;;  %v563_v34 = vmul.f32 %v3666_v18, %v3666_v18  ;;  %v3044_v14 = vld [vmem:[#allocation8 + $0x3c0] ss:$16 sps:$4 sm:$0xff]   ;;  %2303 = vmatprep.subr.bf16.mxu1 %v3046_v11  ;;  %v3052_v16 = vld [vmem:[#allocation8 + $0x3a4] ss:$16 sps:$4 sm:$0xff]  }
 0x1be   :  { %v550_v28 = vadd.f32 %v3668_v19, %v3664_v13  ;;  %v562_v29 = vmul.f32 %v3668_v19, %v3668_v19  ;;  %v3047_v17 = vld [vmem:[#allocation8 + $0x1a0] ss:$16 sps:$4 sm:$0xff]  }
 0x1bf   :  { %v3380_v24 = vpop.eup %3379  ;;  %v564_v48 = vmul.f32 %v3676_v30, %v3676_v30  ;;  %2263 = vmatpush2.bf16.msra.mxu0 %v3041_v12  ;;  %v3050_v23 = vld [vmem:[#allocation8 + $0x3a0] ss:$16 sps:$4 sm:$0xff]  }
 0x1c0   :  { %v3382_v31 = vpop.eup %3381  ;;  %v538_v33 = vadd.f32 1.0, %v3380_v24  ;;  %v569_v37 = vadd.f32 %v562_v29, %v561_v27  ;;  %v551_v38 = vadd.f32 %v550_v28, %v3666_v18  ;;  %2304 = vmatpush2.bf16.msra.mxu1 %v3044_v14  ;;  %2264 = vmatprep.subr.bf16.mxu0 %v3049_v15  ;;  %v3053_v24 = vld [vmem:[#allocation8 + $0x180] ss:$16 sps:$4 sm:$0xff]   ;;  %v3055_v27 = vld [vmem:[#allocation8 + $0x184] ss:$16 sps:$4 sm:$0xff]  }
 0x1c1   :  { %v540_v39 = vadd.f32 1.0, %v3382_v31  ;;  %v3384_v40 = vpop.eup %3383  ;;  %2305 = vmatprep.subr.bf16.mxu1 %v3052_v16  ;;  %v3056_v28 = vld [vmem:[#allocation8 + $0x380] ss:$16 sps:$4 sm:$0xff]   ;;  %v3058_v29 = vld [vmem:[#allocation8 + $0x384] ss:$16 sps:$4 sm:$0xff]  }
 0x1c2   :  { %v3681_v41 = vmul.f32 %v538_v33, %v514_v32  ;;  %v3386_v44 = vpop.eup %3385  ;;  %v552_v47 = vadd.f32 %v551_v38, %v3676_v30  ;;  %v539_v49 = vadd.f32 1.0, %v3384_v40  ;;  %v570_v50 = vadd.f32 %v569_v37, %v563_v34  ;;  %v3061_v31 = vld [vmem:[#allocation8 + $0x164] ss:$16 sps:$4 sm:$0xff]   ;;  %v3059_v33 = vld [vmem:[#allocation8 + $0x160] ss:$16 sps:$4 sm:$0xff]  }
 0x1c3   :  { %v541_v53 = vadd.f32 1.0, %v3386_v44  ;;  %v3688_v54 = vmul.f32 %v540_v39, %v516_v42  ;;  %2265 = vmatpush2.bf16.msra.mxu0 %v3047_v17  ;;  %v3064_v32 = vld [vmem:[#allocation8 + $0x364] ss:$16 sps:$4 sm:$0xff]   ;;  %v3062_v34 = vld [vmem:[#allocation8 + $0x360] ss:$16 sps:$4 sm:$0xff]  }
 0x1c4   :  { %v565_v51 = vmul.f32 %v3681_v41, %v3681_v41  ;;  %v3690_v3 = vmul.f32 %v539_v49, %v515_v43  ;;  %v553_v55 = vadd.f32 %v552_v47, %v3681_v41  ;;  %v571_v56 = vadd.f32 %v570_v50, %v564_v48  ;;  %2306 = vmatpush2.bf16.msra.mxu1 %v3050_v23  ;;  %v3067_v37 = vld [vmem:[#allocation8 + $0x144] ss:$16 sps:$4 sm:$0xff]   ;;  %v3065_v39 = vld [vmem:[#allocation8 + $0x140] ss:$16 sps:$4 sm:$0xff]  }
 0x1c5   :  { %v3693_v57 = vmul.f32 %v541_v53, %v517_v52  ;;  %v567_v61 = vmul.f32 %v3688_v54, %v3688_v54  ;;  %2266 = vmatprep.subr.bf16.mxu0 %v3055_v27  ;;  %2307 = vmatprep.subr.bf16.mxu1 %v3058_v29  ;;  %v3070_v38 = vld [vmem:[#allocation8 + $0x344] ss:$16 sps:$4 sm:$0xff]   ;;  %v3068_v40 = vld [vmem:[#allocation8 + $0x340] ss:$16 sps:$4 sm:$0xff]  }
 0x1c6   :  { %v554_v59 = vadd.f32 %v553_v55, %v3690_v3  ;;  %v566_v60 = vmul.f32 %v3690_v3, %v3690_v3  ;;  %v572_v58 = vadd.f32 %v571_v56, %v565_v51  ;;  %v3073_v42 = vld [vmem:[#allocation8 + $0x124] ss:$16 sps:$4 sm:$0xff]   ;;  %v3071_v44 = vld [vmem:[#allocation8 + $0x120] ss:$16 sps:$4 sm:$0xff]  }
 0x1c7   :  { %v568_v2 = vmul.f32 %v3693_v57, %v3693_v57  ;;  %2267 = vmatpush2.bf16.msra.mxu0 %v3053_v24  ;;  %v3076_v43 = vld [vmem:[#allocation8 + $0x324] ss:$16 sps:$4 sm:$0xff]   ;;  %v3074_v47 = vld [vmem:[#allocation8 + $0x320] ss:$16 sps:$4 sm:$0xff]  }
 0x1c8   :  { %v555_v62 = vadd.f32 %v554_v59, %v3688_v54  ;;  %v573_v63 = vadd.f32 %v572_v58, %v566_v60  ;;  %2308 = vmatpush2.bf16.msra.mxu1 %v3056_v28  ;;  %2268 = vmatprep.subr.bf16.mxu0 %v3061_v31  ;;  %v3079_v48 = vld [vmem:[#allocation8 + $0x104] ss:$16 sps:$4 sm:$0xff]   ;;  %v3077_v50 = vld [vmem:[#allocation8 + $0x100] ss:$16 sps:$4 sm:$0xff]  }
 0x1c9   :  { %2309 = vmatprep.subr.bf16.mxu1 %v3064_v32  ;;  %v3082_v49 = vld [vmem:[#allocation8 + $0x304] ss:$16 sps:$4 sm:$0xff]   ;;  %v3080_v51 = vld [vmem:[#allocation8 + $0x300] ss:$16 sps:$4 sm:$0xff]  }
 0x1ca   :  { %v556_v0 = vadd.f32 %v555_v62, %v3693_v57  ;;  %v574_v4 = vadd.f32 %v573_v63, %v567_v61  ;;  %v3085_v52 = vld [vmem:[#allocation8 + $0x4e4] ss:$16 sps:$4 sm:$0xff]  }
 0x1cb   :  { %2269 = vmatpush2.bf16.msra.mxu0 %v3059_v33  ;;  %v3088_v53 = vld [vmem:[#allocation8 + $0x6e4] ss:$16 sps:$4 sm:$0xff]  }
 0x1cc   :  { %557 = vadd.xlane.f32.xlu0 %v556_v0  ;;  %v575_v5 = vadd.f32 %v574_v4, %v568_v2  ;;  %2310 = vmatpush2.bf16.msra.mxu1 %v3062_v34  ;;  %v3705_v0 = vsub.s32 1, %v3584_v1  ;;  %v3708_v2 = vsub.s32 2, %v3584_v1 }
 0x1cd   :  { %2270 = vmatprep.subr.bf16.mxu0 %v3067_v37  ;;  %2311 = vmatprep.subr.bf16.mxu1 %v3070_v38 }
 0x1ce   :  { %576 = vadd.xlane.f32.xlu1 %v575_v5  ;;  %v603_v4 = vrot.slane %v3632_v21, %v3705_v0  ;;  %v643_v5 = vrot.slane %v3632_v21, %v3708_v2  ;;  %v611_v6 = vrot.slane %v3634_v22, %v3705_v0  ;;  %v651_v7 = vrot.slane %v3634_v22, %v3708_v2 }
 0x1cf   :  { %2271 = vmatpush2.bf16.msra.mxu0 %v3065_v39  ;;  %v607_v8 = vrot.slane %v3640_v25, %v3705_v0  ;;  %v615_v9 = vrot.slane %v3642_v26, %v3705_v0  ;;  %v619_v1 = vrot.slane %v3648_v35, %v3705_v0  ;;  %v659_v10 = vrot.slane %v3648_v35, %v3708_v2 }
 0x1d0   :  { %2312 = vmatpush2.bf16.msra.mxu1 %v3068_v40  ;;  %2272 = vmatprep.subr.bf16.mxu0 %v3073_v42  ;;  %v627_v21 = vrot.slane %v3650_v36, %v3705_v0  ;;  %v667_v11 = vrot.slane %v3650_v36, %v3708_v2  ;;  %v623_v22 = vrot.slane %v3656_v45, %v3705_v0 }
 0x1d1   :  { %2313 = vmatprep.subr.bf16.mxu1 %v3076_v43  ;;  %v631_v12 = vrot.slane %v3658_v46, %v3705_v0  ;;  %v647_v14 = vrot.slane %v3640_v25, %v3708_v2  ;;  %v655_v15 = vrot.slane %v3642_v26, %v3708_v2  ;;  %v663_v35 = vrot.slane %v3656_v45, %v3708_v2 }
 0x1d2   :  { %v671_v16 = vrot.slane %v3658_v46, %v3708_v2 }
 0x1d3   :  { %2273 = vmatpush2.bf16.msra.mxu0 %v3071_v44 }
 0x1d4   :  { %2314 = vmatpush2.bf16.msra.mxu1 %v3074_v47  ;;  %2274 = vmatprep.subr.bf16.mxu0 %v3079_v48 }
 0x1d5   :  { %2315 = vmatprep.subr.bf16.mxu1 %v3082_v49 }
 0x1d7   :  { %2275 = vmatpush2.bf16.msra.mxu0 %v3077_v50 }
 0x1d8   :  { %2316 = vmatpush2.bf16.msra.mxu1 %v3080_v51  ;;  %2326 = vmatprep.subr.bf16.mxu0 %v3085_v52  ;;  %v3083_v52 = vld [vmem:[#allocation8 + $0x4e0] ss:$16 sps:$4 sm:$0xff]  }
 0x1d9   :  { %2367 = vmatprep.subr.bf16.mxu1 %v3088_v53  ;;  %v3086_v53 = vld [vmem:[#allocation8 + $0x6e0] ss:$16 sps:$4 sm:$0xff]  }
 0x255   :  { %v558_v55 = vpop.xlane.xlu0 %557 }
 0x256   :  { %v560_v56 = vmul.f32 0.0009765625, %v558_v55 }
 0x257   :  { %v577_v59 = vpop.xlane.xlu1 %576 }
 0x258   :  { %v578_v60 = vmul.f32 0.0009765625, %v577_v59  ;;  %v579_v58 = vmul.f32 %v560_v56, %v560_v56  ;;  %v583_v36 = vsub.f32 %v3668_v19, %v560_v56  ;;  %v585_v17 = vsub.f32 %v3676_v30, %v560_v56  ;;  %v3091_v59 = vld [vmem:[#allocation8 + $0x4c4] ss:$16 sps:$4 sm:$0xff]  }
 0x259   :  { %v582_v23 = vsub.f32 %v3664_v13, %v560_v56  ;;  %v584_v24 = vsub.f32 %v3666_v18, %v560_v56  ;;  %v587_v25 = vsub.f32 %v3690_v3, %v560_v56  ;;  %v589_v28 = vsub.f32 %v3693_v57, %v560_v56 }
 0x25a   :  { %v580_v62 = vsub.f32 %v578_v60, %v579_v58  ;;  %v586_v26 = vsub.f32 %v3681_v41, %v560_v56  ;;  %v588_v45 = vsub.f32 %v3688_v54, %v560_v56  ;;  %v3094_v60 = vld [vmem:[#allocation8 + $0x6c4] ss:$16 sps:$4 sm:$0xff]  }
 0x25c   :  { %v581_v61 = vmax.f32 %v580_v62, 0.0 }
 0x25e   :  { %v590_v63 = vadd.f32 1e-05, %v581_v61  ;;  %v3089_v61 = vld [vmem:[#allocation8 + $0x4c0] ss:$16 sps:$4 sm:$0xff]  }
 0x260   :  { %3387 = vrsqrt.f32 %v590_v63  ;;  %v3092_v63 = vld [vmem:[#allocation8 + $0x6c0] ss:$16 sps:$4 sm:$0xff]  }
 0x26d   :  { %v3388_v27 = vpop.eup %3387 }
 0x26e   :  { %v593_v29 = vmul.f32 %v3388_v27, %v583_v36  ;;  %v595_v31 = vmul.f32 %v3388_v27, %v585_v17  ;;  %v592_v46 = vmul.f32 %v3388_v27, %v582_v23  ;;  %v594_v32 = vmul.f32 %v3388_v27, %v584_v24  ;;  %v3121_v36 = vld [vmem:[#allocation8 + $0x424] ss:$16 sps:$4 sm:$0xff]   ;;  %v3119_v23 = vld [vmem:[#allocation8 + $0x420] ss:$16 sps:$4 sm:$0xff]  }
 0x26f   :  { %v597_v19 = vmul.f32 %v3388_v27, %v587_v25  ;;  %v599_v33 = vmul.f32 %v3388_v27, %v589_v28  ;;  %v596_v30 = vmul.f32 %v3388_v27, %v586_v26  ;;  %v598_v34 = vmul.f32 %v3388_v27, %v588_v45  ;;  %v3124_v17 = vld [vmem:[#allocation8 + $0x624] ss:$16 sps:$4 sm:$0xff]   ;;  %v3122_v24 = vld [vmem:[#allocation8 + $0x620] ss:$16 sps:$4 sm:$0xff]  }
 0x270   :  { %v633_v13 = vmul.f32 %v607_v8, %v593_v29  ;;  %v635_v37 = vmul.f32 %v615_v9, %v595_v31  ;;  %v632_v18 = vmul.f32 %v603_v4, %v592_v46  ;;  %v634_v38 = vmul.f32 %v611_v6, %v594_v32  ;;  %v3097_v4 = vld [vmem:[#allocation8 + $0x4a4] ss:$16 sps:$4 sm:$0xff]   ;;  %v3095_v6 = vld [vmem:[#allocation8 + $0x4a0] ss:$16 sps:$4 sm:$0xff]  }
 0x271   :  { %v637_v39 = vmul.f32 %v623_v22, %v597_v19  ;;  %v639_v3 = vmul.f32 %v631_v12, %v599_v33  ;;  %v636_v40 = vmul.f32 %v619_v1, %v596_v30  ;;  %v638_v57 = vmul.f32 %v627_v21, %v598_v34  ;;  %v3103_v8 = vld [vmem:[#allocation8 + $0x484] ss:$16 sps:$4 sm:$0xff]   ;;  %v3101_v1 = vld [vmem:[#allocation8 + $0x480] ss:$16 sps:$4 sm:$0xff]  }
 0x272   :  { %v673_v42 = vadd.f32 %v647_v14, %v633_v13  ;;  %v675_v41 = vadd.f32 %v655_v15, %v635_v37  ;;  %v672_v43 = vadd.f32 %v643_v5, %v632_v18  ;;  %v674_v54 = vadd.f32 %v651_v7, %v634_v38  ;;  %v3100_v5 = vld [vmem:[#allocation8 + $0x6a4] ss:$16 sps:$4 sm:$0xff]   ;;  %v3098_v7 = vld [vmem:[#allocation8 + $0x6a0] ss:$16 sps:$4 sm:$0xff]  }
 0x273   :  { %v677_v44 = vadd.f32 %v663_v35, %v637_v39  ;;  %v679_v47 = vadd.f32 %v671_v16, %v639_v3  ;;  %v3750_v48 = vadd.f32 %v659_v10, %v636_v40  ;;  %v3752_v49 = vadd.f32 %v667_v11, %v638_v57  ;;  %v3106_v9 = vld [vmem:[#allocation8 + $0x684] ss:$16 sps:$4 sm:$0xff]   ;;  %v3104_v10 = vld [vmem:[#allocation8 + $0x680] ss:$16 sps:$4 sm:$0xff]  }
 0x274   :  { %v3754_v50 = vpack.c.bf16 %v673_v42, %v673_v42  ;;  %v3756_v51 = vpack.c.bf16 %v675_v41, %v675_v41  ;;  %v3758_v55 = vpack.c.bf16 %v672_v43, %v672_v43  ;;  %v3760_v56 = vpack.c.bf16 %v674_v54, %v674_v54  ;;  %v3109_v21 = vld [vmem:[#allocation8 + $0x464] ss:$16 sps:$4 sm:$0xff]   ;;  %v3107_v22 = vld [vmem:[#allocation8 + $0x460] ss:$16 sps:$4 sm:$0xff]  }
 0x275   :  { %v3766_v58 = vpack.c.bf16 %v677_v44, %v677_v44  ;;  %v3768_v62 = vpack.c.bf16 %v679_v47, %v679_v47  ;;  %v3112_v11 = vld [vmem:[#allocation8 + $0x664] ss:$16 sps:$4 sm:$0xff]   ;;  %v3110_v12 = vld [vmem:[#allocation8 + $0x660] ss:$16 sps:$4 sm:$0xff]  }
 0x276   :  { %2276 = vmatprep.mubr.bf16.mxu0 %v3754_v50  ;;  %2317 = vmatprep.mubr.bf16.mxu1 %v3756_v51  ;;  %v3115_v14 = vld [vmem:[#allocation8 + $0x444] ss:$16 sps:$4 sm:$0xff]   ;;  %v3113_v35 = vld [vmem:[#allocation8 + $0x440] ss:$16 sps:$4 sm:$0xff]  }
 0x277   :  { %2277 = vmatmul.mubr.bf16.vlgmr.msra.gmra.mxu0 %v3758_v55  ;;  %2318 = vmatmul.mubr.bf16.vlgmr.msra.gmra.mxu1 %v3760_v56  ;;  %v3118_v15 = vld [vmem:[#allocation8 + $0x644] ss:$16 sps:$4 sm:$0xff]   ;;  %v3116_v16 = vld [vmem:[#allocation8 + $0x640] ss:$16 sps:$4 sm:$0xff]  }
 0x278   :  { %2327 = vmatpush1.bf16.msra.mxu0 %v3083_v52  ;;  %2368 = vmatpush1.bf16.msra.mxu1 %v3086_v53  ;;  %v3127_v27 = vld [vmem:[#allocation8 + $0x404] ss:$16 sps:$4 sm:$0xff]   ;;  %v3125_v28 = vld [vmem:[#allocation8 + $0x400] ss:$16 sps:$4 sm:$0xff]  }
 0x279   :  { %2358 = vmatprep.mubr.bf16.mxu0 %v3766_v58  ;;  %2399 = vmatprep.mubr.bf16.mxu1 %v3768_v62  ;;  %v3130_v25 = vld [vmem:[#allocation8 + $0x604] ss:$16 sps:$4 sm:$0xff]   ;;  %v3128_v26 = vld [vmem:[#allocation8 + $0x600] ss:$16 sps:$4 sm:$0xff]  }
 0x27a   :  { %2328 = vmatprep.subr.bf16.mxu0 %v3091_v59  ;;  %2369 = vmatprep.subr.bf16.mxu1 %v3094_v60  ;;  %v3133_v45 = vld [vmem:[#allocation8 + $0x5e4] ss:$16 sps:$4 sm:$0xff]   ;;  %v3131_v31 = vld [vmem:[#allocation8 + $0x5e0] ss:$16 sps:$4 sm:$0xff]  }
 0x27b   :  { %v3136_v29 = vld [vmem:[#allocation8 + $0x7e4] ss:$16 sps:$4 sm:$0xff]   ;;  %v3134_v46 = vld [vmem:[#allocation8 + $0x7e0] ss:$16 sps:$4 sm:$0xff]  }
 0x27c   :  { %2329 = vmatpush1.bf16.msra.mxu0 %v3089_v61  ;;  %2370 = vmatpush1.bf16.msra.mxu1 %v3092_v63  ;;  %v3139_v32 = vld [vmem:[#allocation8 + $0x5c4] ss:$16 sps:$4 sm:$0xff]   ;;  %v3137_v33 = vld [vmem:[#allocation8 + $0x5c0] ss:$16 sps:$4 sm:$0xff]  }
 0x27d   :  { %2330 = vmatprep.subr.bf16.mxu0 %v3097_v4  ;;  %2371 = vmatprep.subr.bf16.mxu1 %v3100_v5  ;;  %v3142_v19 = vld [vmem:[#allocation8 + $0x7c4] ss:$16 sps:$4 sm:$0xff]   ;;  %v3140_v30 = vld [vmem:[#allocation8 + $0x7c0] ss:$16 sps:$4 sm:$0xff]  }
 0x27e   :  { %v3145_v34 = vld [vmem:[#allocation8 + $0x5a4] ss:$16 sps:$4 sm:$0xff]   ;;  %v3143_v37 = vld [vmem:[#allocation8 + $0x5a0] ss:$16 sps:$4 sm:$0xff]  }
 0x27f   :  { %v3148_v13 = vld [vmem:[#allocation8 + $0x7a4] ss:$16 sps:$4 sm:$0xff]   ;;  %v3146_v18 = vld [vmem:[#allocation8 + $0x7a0] ss:$16 sps:$4 sm:$0xff]  }
 0x280   :  { %2331 = vmatpush1.bf16.msra.mxu0 %v3095_v6  ;;  %2372 = vmatpush1.bf16.msra.mxu1 %v3098_v7  ;;  %v3151_v38 = vld [vmem:[#allocation8 + $0x584] ss:$16 sps:$4 sm:$0xff]   ;;  %v3149_v3 = vld [vmem:[#allocation8 + $0x580] ss:$16 sps:$4 sm:$0xff]   ;;  %v3181_v7 = vld [vmem:[#allocation8 + $0xec] ss:$16 sps:$4 sm:$0xff]  }
 0x281   :  { %2332 = vmatprep.subr.bf16.mxu0 %v3103_v8  ;;  %2373 = vmatprep.subr.bf16.mxu1 %v3106_v9  ;;  %v3154_v39 = vld [vmem:[#allocation8 + $0x784] ss:$16 sps:$4 sm:$0xff]   ;;  %v3152_v40 = vld [vmem:[#allocation8 + $0x780] ss:$16 sps:$4 sm:$0xff]   ;;  %v3184_v8 = vld [vmem:[#allocation8 + $0x2ec] ss:$16 sps:$4 sm:$0xff]  }
 0x282   :  { %v3157_v57 = vld [vmem:[#allocation8 + $0x564] ss:$16 sps:$4 sm:$0xff]   ;;  %v3155_v41 = vld [vmem:[#allocation8 + $0x560] ss:$16 sps:$4 sm:$0xff]   ;;  %v3179_v9 = vld [vmem:[#allocation8 + $0xe8] ss:$16 sps:$4 sm:$0xff]  }
 0x283   :  { %v3160_v42 = vld [vmem:[#allocation8 + $0x764] ss:$16 sps:$4 sm:$0xff]   ;;  %v3158_v43 = vld [vmem:[#allocation8 + $0x760] ss:$16 sps:$4 sm:$0xff]  }
 0x284   :  { %2333 = vmatpush1.bf16.msra.mxu0 %v3101_v1  ;;  %2374 = vmatpush1.bf16.msra.mxu1 %v3104_v10  ;;  %v3163_v54 = vld [vmem:[#allocation8 + $0x544] ss:$16 sps:$4 sm:$0xff]   ;;  %v3161_v47 = vld [vmem:[#allocation8 + $0x540] ss:$16 sps:$4 sm:$0xff]   ;;  %v3774_v1 = vpack.c.bf16 %v3750_v48, %v3750_v48  ;;  %v3778_v10 = vpack.c.bf16 %v3752_v49, %v3752_v49  ;;  %v3188_v48 = vld [vmem:[#allocation8 + $0x2c8] ss:$16 sps:$4 sm:$0xff]  }
 0x285   :  { %2334 = vmatprep.subr.bf16.mxu0 %v3109_v21  ;;  %2375 = vmatprep.subr.bf16.mxu1 %v3112_v11  ;;  %v3166_v44 = vld [vmem:[#allocation8 + $0x744] ss:$16 sps:$4 sm:$0xff]   ;;  %v3164_v52 = vld [vmem:[#allocation8 + $0x740] ss:$16 sps:$4 sm:$0xff]   ;;  %v3182_v21 = vld [vmem:[#allocation8 + $0x2e8] ss:$16 sps:$4 sm:$0xff]  }
 0x286   :  { %v3169_v53 = vld [vmem:[#allocation8 + $0x524] ss:$16 sps:$4 sm:$0xff]   ;;  %v3167_v60 = vld [vmem:[#allocation8 + $0x520] ss:$16 sps:$4 sm:$0xff]   ;;  %v3187_v11 = vld [vmem:[#allocation8 + $0xcc] ss:$16 sps:$4 sm:$0xff]  }
 0x287   :  { %v3172_v59 = vld [vmem:[#allocation8 + $0x724] ss:$16 sps:$4 sm:$0xff]   ;;  %v3170_v61 = vld [vmem:[#allocation8 + $0x720] ss:$16 sps:$4 sm:$0xff]   ;;  %v3196_v49 = vld [vmem:[#allocation8 + $0x2ac] ss:$16 sps:$4 sm:$0xff]  }
 0x288   :  { %2335 = vmatpush1.bf16.msra.mxu0 %v3107_v22  ;;  %2376 = vmatpush1.bf16.msra.mxu1 %v3110_v12  ;;  %v3175_v63 = vld [vmem:[#allocation8 + $0x504] ss:$16 sps:$4 sm:$0xff]   ;;  %v3173_v5 = vld [vmem:[#allocation8 + $0x500] ss:$16 sps:$4 sm:$0xff]   ;;  %v3190_v22 = vld [vmem:[#allocation8 + $0x2cc] ss:$16 sps:$4 sm:$0xff]  }
 0x289   :  { %2336 = vmatprep.subr.bf16.mxu0 %v3115_v14  ;;  %2377 = vmatprep.subr.bf16.mxu1 %v3118_v15  ;;  %v3178_v4 = vld [vmem:[#allocation8 + $0x704] ss:$16 sps:$4 sm:$0xff]   ;;  %v3176_v6 = vld [vmem:[#allocation8 + $0x700] ss:$16 sps:$4 sm:$0xff]   ;;  %v3185_v12 = vld [vmem:[#allocation8 + $0xc8] ss:$16 sps:$4 sm:$0xff]  }
 0x28a   :  { %v3193_v14 = vld [vmem:[#allocation8 + $0xac] ss:$16 sps:$4 sm:$0xff]   ;;  %v3191_v15 = vld [vmem:[#allocation8 + $0xa8] ss:$16 sps:$4 sm:$0xff]  }
 0x28c   :  { %2337 = vmatpush1.bf16.msra.mxu0 %v3113_v35  ;;  %2378 = vmatpush1.bf16.msra.mxu1 %v3116_v16  ;;  %v3194_v35 = vld [vmem:[#allocation8 + $0x2a8] ss:$16 sps:$4 sm:$0xff]   ;;  %v3199_v16 = vld [vmem:[#allocation8 + $0x8c] ss:$16 sps:$4 sm:$0xff]  }
 0x28d   :  { %2338 = vmatprep.subr.bf16.mxu0 %v3121_v36  ;;  %2379 = vmatprep.subr.bf16.mxu1 %v3124_v17  ;;  %v3202_v36 = vld [vmem:[#allocation8 + $0x28c] ss:$16 sps:$4 sm:$0xff]   ;;  %v3197_v17 = vld [vmem:[#allocation8 + $0x88] ss:$16 sps:$4 sm:$0xff]  }
 0x290   :  { %2339 = vmatpush1.bf16.msra.mxu0 %v3119_v23  ;;  %2380 = vmatpush1.bf16.msra.mxu1 %v3122_v24  ;;  %v3205_v23 = vld [vmem:[#allocation8 + $0x6c] ss:$16 sps:$4 sm:$0xff]   ;;  %v3203_v24 = vld [vmem:[#allocation8 + $0x68] ss:$16 sps:$4 sm:$0xff]  }
 0x291   :  { %2340 = vmatprep.subr.bf16.mxu0 %v3127_v27  ;;  %2381 = vmatprep.subr.bf16.mxu1 %v3130_v25  ;;  %v3206_v27 = vld [vmem:[#allocation8 + $0x268] ss:$16 sps:$4 sm:$0xff]   ;;  %v3211_v25 = vld [vmem:[#allocation8 + $0x4c] ss:$16 sps:$4 sm:$0xff]  }
 0x294   :  { %2341 = vmatpush1.bf16.msra.mxu0 %v3125_v28  ;;  %2382 = vmatpush1.bf16.msra.mxu1 %v3128_v26  ;;  %v3214_v28 = vld [vmem:[#allocation8 + $0x24c] ss:$16 sps:$4 sm:$0xff]   ;;  %v3209_v26 = vld [vmem:[#allocation8 + $0x48] ss:$16 sps:$4 sm:$0xff]  }
 0x295   :  { %2342 = vmatprep.subr.bf16.mxu0 %v3133_v45  ;;  %2383 = vmatprep.subr.bf16.mxu1 %v3136_v29  ;;  %v3212_v45 = vld [vmem:[#allocation8 + $0x248] ss:$16 sps:$4 sm:$0xff]   ;;  %v3217_v29 = vld [vmem:[#allocation8 + $0x2c] ss:$16 sps:$4 sm:$0xff]  }
 0x298   :  { %2343 = vmatpush2.bf16.msra.mxu0 %v3131_v31  ;;  %2384 = vmatpush2.bf16.msra.mxu1 %v3134_v46  ;;  %v3220_v31 = vld [vmem:[#allocation8 + $0x22c] ss:$16 sps:$4 sm:$0xff]   ;;  %v3215_v46 = vld [vmem:[#allocation8 + $0x28] ss:$16 sps:$4 sm:$0xff]  }
 0x299   :  { %2344 = vmatprep.subr.bf16.mxu0 %v3139_v32  ;;  %2385 = vmatprep.subr.bf16.mxu1 %v3142_v19  ;;  %v3218_v32 = vld [vmem:[#allocation8 + $0x228] ss:$16 sps:$4 sm:$0xff]   ;;  %v3223_v19 = vld [vmem:[#allocation8 + $0xc] ss:$16 sps:$4 sm:$0xff]  }
 0x29c   :  { %2345 = vmatpush2.bf16.msra.mxu0 %v3137_v33  ;;  %2386 = vmatpush2.bf16.msra.mxu1 %v3140_v30  ;;  %v3226_v33 = vld [vmem:[#allocation8 + $0x20c] ss:$16 sps:$4 sm:$0xff]   ;;  %v3221_v30 = vld [vmem:[#allocation8 + $0x8] ss:$16 sps:$4 sm:$0xff]  }
 0x29d   :  { %2346 = vmatprep.subr.bf16.mxu0 %v3145_v34  ;;  %2387 = vmatprep.subr.bf16.mxu1 %v3148_v13  ;;  %v3224_v34 = vld [vmem:[#allocation8 + $0x208] ss:$16 sps:$4 sm:$0xff]   ;;  %v3229_v13 = vld [vmem:[#allocation8 + $0x1ec] ss:$16 sps:$4 sm:$0xff]  }
 0x2a0   :  { %2347 = vmatpush2.bf16.msra.mxu0 %v3143_v37  ;;  %2388 = vmatpush2.bf16.msra.mxu1 %v3146_v18  ;;  %v3232_v37 = vld [vmem:[#allocation8 + $0x3ec] ss:$16 sps:$4 sm:$0xff]   ;;  %v3227_v18 = vld [vmem:[#allocation8 + $0x1e8] ss:$16 sps:$4 sm:$0xff]  }
 0x2a1   :  { %2348 = vmatprep.subr.bf16.mxu0 %v3151_v38  ;;  %2389 = vmatprep.subr.bf16.mxu1 %v3154_v39  ;;  %v3230_v38 = vld [vmem:[#allocation8 + $0x3e8] ss:$16 sps:$4 sm:$0xff]   ;;  %v3235_v39 = vld [vmem:[#allocation8 + $0x1cc] ss:$16 sps:$4 sm:$0xff]  }
 0x2a4   :  { %2349 = vmatpush2.bf16.msra.mxu0 %v3149_v3  ;;  %2390 = vmatpush2.bf16.msra.mxu1 %v3152_v40  ;;  %v3238_v3 = vld [vmem:[#allocation8 + $0x3cc] ss:$16 sps:$4 sm:$0xff]   ;;  %v3233_v40 = vld [vmem:[#allocation8 + $0x1c8] ss:$16 sps:$4 sm:$0xff]  }
 0x2a5   :  { %2350 = vmatprep.subr.bf16.mxu0 %v3157_v57  ;;  %2391 = vmatprep.subr.bf16.mxu1 %v3160_v42  ;;  %v3236_v57 = vld [vmem:[#allocation8 + $0x3c8] ss:$16 sps:$4 sm:$0xff]   ;;  %v3241_v42 = vld [vmem:[#allocation8 + $0x1ac] ss:$16 sps:$4 sm:$0xff]  }
 0x2a8   :  { %2351 = vmatpush2.bf16.msra.mxu0 %v3155_v41  ;;  %2392 = vmatpush2.bf16.msra.mxu1 %v3158_v43  ;;  %v3244_v41 = vld [vmem:[#allocation8 + $0x3ac] ss:$16 sps:$4 sm:$0xff]   ;;  %v3239_v43 = vld [vmem:[#allocation8 + $0x1a8] ss:$16 sps:$4 sm:$0xff]  }
 0x2a9   :  { %2352 = vmatprep.subr.bf16.mxu0 %v3163_v54  ;;  %2393 = vmatprep.subr.bf16.mxu1 %v3166_v44  ;;  %v3242_v54 = vld [vmem:[#allocation8 + $0x3a8] ss:$16 sps:$4 sm:$0xff]   ;;  %v3247_v44 = vld [vmem:[#allocation8 + $0x18c] ss:$16 sps:$4 sm:$0xff]  }
 0x2ac   :  { %2353 = vmatpush2.bf16.msra.mxu0 %v3161_v47  ;;  %2394 = vmatpush2.bf16.msra.mxu1 %v3164_v52  ;;  %v3250_v47 = vld [vmem:[#allocation8 + $0x38c] ss:$16 sps:$4 sm:$0xff]   ;;  %v3245_v52 = vld [vmem:[#allocation8 + $0x188] ss:$16 sps:$4 sm:$0xff]  }
 0x2ad   :  { %2354 = vmatprep.subr.bf16.mxu0 %v3169_v53  ;;  %2395 = vmatprep.subr.bf16.mxu1 %v3172_v59  ;;  %v3248_v53 = vld [vmem:[#allocation8 + $0x388] ss:$16 sps:$4 sm:$0xff]   ;;  %v3253_v59 = vld [vmem:[#allocation8 + $0x16c] ss:$16 sps:$4 sm:$0xff]  }
 0x2b0   :  { %2355 = vmatpush2.bf16.msra.mxu0 %v3167_v60  ;;  %2396 = vmatpush2.bf16.msra.mxu1 %v3170_v61  ;;  %v3256_v60 = vld [vmem:[#allocation8 + $0x36c] ss:$16 sps:$4 sm:$0xff]   ;;  %v3251_v61 = vld [vmem:[#allocation8 + $0x168] ss:$16 sps:$4 sm:$0xff]  }
 0x2b1   :  { %2356 = vmatprep.subr.bf16.mxu0 %v3175_v63  ;;  %2397 = vmatprep.subr.bf16.mxu1 %v3178_v4  ;;  %v3254_v63 = vld [vmem:[#allocation8 + $0x368] ss:$16 sps:$4 sm:$0xff]   ;;  %v3259_v4 = vld [vmem:[#allocation8 + $0x14c] ss:$16 sps:$4 sm:$0xff]  }
 0x2b4   :  { %2357 = vmatpush2.bf16.msra.mxu0 %v3173_v5  ;;  %2398 = vmatpush2.bf16.msra.mxu1 %v3176_v6  ;;  %v3262_v5 = vld [vmem:[#allocation8 + $0x34c] ss:$16 sps:$4 sm:$0xff]   ;;  %v3257_v6 = vld [vmem:[#allocation8 + $0x148] ss:$16 sps:$4 sm:$0xff]  }
 0x2b5   :  { %2408 = vmatprep.subr.bf16.mxu0 %v3181_v7  ;;  %2449 = vmatprep.subr.bf16.mxu1 %v3184_v8  ;;  %v3260_v7 = vld [vmem:[#allocation8 + $0x348] ss:$16 sps:$4 sm:$0xff]   ;;  %v3265_v8 = vld [vmem:[#allocation8 + $0x12c] ss:$16 sps:$4 sm:$0xff]  }
 0x2b7   :  { %2359 = vmatmul.mubr.bf16.vlgmr.msra.gmra.mxu0 %v3774_v1  ;;  %2400 = vmatmul.mubr.bf16.vlgmr.msra.gmra.mxu1 %v3778_v10 }
 0x2b8   :  { %2409 = vmatpush1.bf16.msra.mxu0 %v3179_v9  ;;  %2440 = vmatprep.mubr.bf16.mxu0 %v3754_v50  ;;  %v3200_v50 = vld [vmem:[#allocation8 + $0x288] ss:$16 sps:$4 sm:$0xff]   ;;  %v3268_v9 = vld [vmem:[#allocation8 + $0x32c] ss:$16 sps:$4 sm:$0xff]  }
 0x2b9   :  { %2450 = vmatpush1.bf16.msra.mxu1 %v3182_v21  ;;  %2481 = vmatprep.mubr.bf16.mxu1 %v3756_v51  ;;  %v3208_v51 = vld [vmem:[#allocation8 + $0x26c] ss:$16 sps:$4 sm:$0xff]   ;;  %v3263_v21 = vld [vmem:[#allocation8 + $0x128] ss:$16 sps:$4 sm:$0xff]  }
 0x2ba   :  { %2410 = vmatprep.subr.bf16.mxu0 %v3187_v11  ;;  %2451 = vmatprep.subr.bf16.mxu1 %v3190_v22  ;;  %v3266_v11 = vld [vmem:[#allocation8 + $0x328] ss:$16 sps:$4 sm:$0xff]   ;;  %v3271_v22 = vld [vmem:[#allocation8 + $0x10c] ss:$16 sps:$4 sm:$0xff]  }
 0x2bc   :  { %2411 = vmatpush1.bf16.msra.mxu0 %v3185_v12  ;;  %v3274_v12 = vld [vmem:[#allocation8 + $0x30c] ss:$16 sps:$4 sm:$0xff]  }
 0x2bd   :  { %2452 = vmatpush1.bf16.msra.mxu1 %v3188_v48  ;;  %2412 = vmatprep.subr.bf16.mxu0 %v3193_v14  ;;  %v3269_v48 = vld [vmem:[#allocation8 + $0x108] ss:$16 sps:$4 sm:$0xff]  }
 0x2be   :  { %2453 = vmatprep.subr.bf16.mxu1 %v3196_v49  ;;  %v3272_v14 = vld [vmem:[#allocation8 + $0x308] ss:$16 sps:$4 sm:$0xff]   ;;  %v3277_v49 = vld [vmem:[#allocation8 + $0x4ec] ss:$16 sps:$4 sm:$0xff]  }
 0x2c0   :  { %2413 = vmatpush1.bf16.msra.mxu0 %v3191_v15  ;;  %v3280_v15 = vld [vmem:[#allocation8 + $0x6ec] ss:$16 sps:$4 sm:$0xff]  }
 0x2c1   :  { %2454 = vmatpush1.bf16.msra.mxu1 %v3194_v35  ;;  %2414 = vmatprep.subr.bf16.mxu0 %v3199_v16  ;;  %v3275_v35 = vld [vmem:[#allocation8 + $0x4e8] ss:$16 sps:$4 sm:$0xff]  }
 0x2c2   :  { %2455 = vmatprep.subr.bf16.mxu1 %v3202_v36  ;;  %v3278_v16 = vld [vmem:[#allocation8 + $0x6e8] ss:$16 sps:$4 sm:$0xff]   ;;  %v3283_v36 = vld [vmem:[#allocation8 + $0x4cc] ss:$16 sps:$4 sm:$0xff]  }
 0x2c4   :  { %2415 = vmatpush1.bf16.msra.mxu0 %v3197_v17  ;;  %v3286_v17 = vld [vmem:[#allocation8 + $0x6cc] ss:$16 sps:$4 sm:$0xff]  }
 0x2c5   :  { %2456 = vmatpush1.bf16.msra.mxu1 %v3200_v50  ;;  %2416 = vmatprep.subr.bf16.mxu0 %v3205_v23  ;;  %v3281_v50 = vld [vmem:[#allocation8 + $0x4c8] ss:$16 sps:$4 sm:$0xff]  }
 0x2c6   :  { %2457 = vmatprep.subr.bf16.mxu1 %v3208_v51  ;;  %v3284_v23 = vld [vmem:[#allocation8 + $0x6c8] ss:$16 sps:$4 sm:$0xff]   ;;  %v3289_v51 = vld [vmem:[#allocation8 + $0x4ac] ss:$16 sps:$4 sm:$0xff]  }
 0x2c8   :  { %2417 = vmatpush1.bf16.msra.mxu0 %v3203_v24  ;;  %v3292_v24 = vld [vmem:[#allocation8 + $0x6ac] ss:$16 sps:$4 sm:$0xff]  }
 0x2c9   :  { %2458 = vmatpush1.bf16.msra.mxu1 %v3206_v27  ;;  %2418 = vmatprep.subr.bf16.mxu0 %v3211_v25  ;;  %v3287_v27 = vld [vmem:[#allocation8 + $0x4a8] ss:$16 sps:$4 sm:$0xff]   ;;  %v3295_v25 = vld [vmem:[#allocation8 + $0x48c] ss:$16 sps:$4 sm:$0xff]  }
 0x2ca   :  { %2459 = vmatprep.subr.bf16.mxu1 %v3214_v28  ;;  %v3293_v28 = vld [vmem:[#allocation8 + $0x488] ss:$16 sps:$4 sm:$0xff]  }
 0x2cc   :  { %2419 = vmatpush1.bf16.msra.mxu0 %v3209_v26  ;;  %v3301_v26 = vld [vmem:[#allocation8 + $0x46c] ss:$16 sps:$4 sm:$0xff]  }
 0x2cd   :  { %2460 = vmatpush1.bf16.msra.mxu1 %v3212_v45  ;;  %2420 = vmatprep.subr.bf16.mxu0 %v3217_v29  ;;  %v3304_v45 = vld [vmem:[#allocation8 + $0x66c] ss:$16 sps:$4 sm:$0xff]   ;;  %v3302_v29 = vld [vmem:[#allocation8 + $0x668] ss:$16 sps:$4 sm:$0xff]  }
 0x2ce   :  { %2461 = vmatprep.subr.bf16.mxu1 %v3220_v31  ;;  %v3307_v31 = vld [vmem:[#allocation8 + $0x44c] ss:$16 sps:$4 sm:$0xff]  }
 0x2d0   :  { %2421 = vmatpush1.bf16.msra.mxu0 %v3215_v46  ;;  %v3310_v46 = vld [vmem:[#allocation8 + $0x64c] ss:$16 sps:$4 sm:$0xff]  }
 0x2d1   :  { %2462 = vmatpush1.bf16.msra.mxu1 %v3218_v32  ;;  %2422 = vmatprep.subr.bf16.mxu0 %v3223_v19  ;;  %v3305_v32 = vld [vmem:[#allocation8 + $0x448] ss:$16 sps:$4 sm:$0xff]  }
 0x2d2   :  { %2463 = vmatprep.subr.bf16.mxu1 %v3226_v33  ;;  %v3308_v19 = vld [vmem:[#allocation8 + $0x648] ss:$16 sps:$4 sm:$0xff]   ;;  %v3313_v33 = vld [vmem:[#allocation8 + $0x42c] ss:$16 sps:$4 sm:$0xff]  }
 0x2d4   :  { %2423 = vmatpush1.bf16.msra.mxu0 %v3221_v30  ;;  %v3316_v30 = vld [vmem:[#allocation8 + $0x62c] ss:$16 sps:$4 sm:$0xff]  }
 0x2d5   :  { %2464 = vmatpush1.bf16.msra.mxu1 %v3224_v34  ;;  %2424 = vmatprep.subr.bf16.mxu0 %v3229_v13  ;;  %v3311_v34 = vld [vmem:[#allocation8 + $0x428] ss:$16 sps:$4 sm:$0xff]  }
 0x2d6   :  { %2465 = vmatprep.subr.bf16.mxu1 %v3232_v37  ;;  %v3314_v13 = vld [vmem:[#allocation8 + $0x628] ss:$16 sps:$4 sm:$0xff]   ;;  %v3319_v37 = vld [vmem:[#allocation8 + $0x40c] ss:$16 sps:$4 sm:$0xff]  }
 0x2d8   :  { %2425 = vmatpush2.bf16.msra.mxu0 %v3227_v18  ;;  %v3322_v18 = vld [vmem:[#allocation8 + $0x60c] ss:$16 sps:$4 sm:$0xff]  }
 0x2d9   :  { %2466 = vmatpush2.bf16.msra.mxu1 %v3230_v38  ;;  %2426 = vmatprep.subr.bf16.mxu0 %v3235_v39  ;;  %v3317_v38 = vld [vmem:[#allocation8 + $0x408] ss:$16 sps:$4 sm:$0xff]  }
 0x2da   :  { %2467 = vmatprep.subr.bf16.mxu1 %v3238_v3  ;;  %v3320_v39 = vld [vmem:[#allocation8 + $0x608] ss:$16 sps:$4 sm:$0xff]   ;;  %v3325_v3 = vld [vmem:[#allocation8 + $0x5ec] ss:$16 sps:$4 sm:$0xff]  }
 0x2dc   :  { %2427 = vmatpush2.bf16.msra.mxu0 %v3233_v40  ;;  %v3328_v40 = vld [vmem:[#allocation8 + $0x7ec] ss:$16 sps:$4 sm:$0xff]  }
 0x2dd   :  { %2468 = vmatpush2.bf16.msra.mxu1 %v3236_v57  ;;  %2428 = vmatprep.subr.bf16.mxu0 %v3241_v42  ;;  %v3323_v57 = vld [vmem:[#allocation8 + $0x5e8] ss:$16 sps:$4 sm:$0xff]  }
 0x2de   :  { %2469 = vmatprep.subr.bf16.mxu1 %v3244_v41  ;;  %v3326_v42 = vld [vmem:[#allocation8 + $0x7e8] ss:$16 sps:$4 sm:$0xff]   ;;  %v3331_v41 = vld [vmem:[#allocation8 + $0x5cc] ss:$16 sps:$4 sm:$0xff]  }
 0x2e0   :  { %2429 = vmatpush2.bf16.msra.mxu0 %v3239_v43  ;;  %v3334_v43 = vld [vmem:[#allocation8 + $0x7cc] ss:$16 sps:$4 sm:$0xff]  }
 0x2e1   :  { %2470 = vmatpush2.bf16.msra.mxu1 %v3242_v54  ;;  %2430 = vmatprep.subr.bf16.mxu0 %v3247_v44  ;;  %v3329_v54 = vld [vmem:[#allocation8 + $0x5c8] ss:$16 sps:$4 sm:$0xff]  }
 0x2e2   :  { %2471 = vmatprep.subr.bf16.mxu1 %v3250_v47  ;;  %v3332_v44 = vld [vmem:[#allocation8 + $0x7c8] ss:$16 sps:$4 sm:$0xff]   ;;  %v3337_v47 = vld [vmem:[#allocation8 + $0x5ac] ss:$16 sps:$4 sm:$0xff]  }
 0x2e4   :  { %2431 = vmatpush2.bf16.msra.mxu0 %v3245_v52  ;;  %v3340_v52 = vld [vmem:[#allocation8 + $0x7ac] ss:$16 sps:$4 sm:$0xff]  }
 0x2e5   :  { %2472 = vmatpush2.bf16.msra.mxu1 %v3248_v53  ;;  %2432 = vmatprep.subr.bf16.mxu0 %v3253_v59  ;;  %v3335_v53 = vld [vmem:[#allocation8 + $0x5a8] ss:$16 sps:$4 sm:$0xff]  }
 0x2e6   :  { %2473 = vmatprep.subr.bf16.mxu1 %v3256_v60  ;;  %v3338_v59 = vld [vmem:[#allocation8 + $0x7a8] ss:$16 sps:$4 sm:$0xff]   ;;  %v3343_v60 = vld [vmem:[#allocation8 + $0x58c] ss:$16 sps:$4 sm:$0xff]  }
 0x2e8   :  { %2433 = vmatpush2.bf16.msra.mxu0 %v3251_v61  ;;  %v3346_v61 = vld [vmem:[#allocation8 + $0x78c] ss:$16 sps:$4 sm:$0xff]  }
 0x2e9   :  { %2474 = vmatpush2.bf16.msra.mxu1 %v3254_v63  ;;  %2434 = vmatprep.subr.bf16.mxu0 %v3259_v4  ;;  %v3341_v63 = vld [vmem:[#allocation8 + $0x588] ss:$16 sps:$4 sm:$0xff]  }
 0x2ea   :  { %2475 = vmatprep.subr.bf16.mxu1 %v3262_v5  ;;  %v3344_v4 = vld [vmem:[#allocation8 + $0x788] ss:$16 sps:$4 sm:$0xff]   ;;  %v3349_v5 = vld [vmem:[#allocation8 + $0x56c] ss:$16 sps:$4 sm:$0xff]  }
 0x2ec   :  { %2435 = vmatpush2.bf16.msra.mxu0 %v3257_v6  ;;  %v3352_v6 = vld [vmem:[#allocation8 + $0x76c] ss:$16 sps:$4 sm:$0xff]  }
 0x2ed   :  { %2476 = vmatpush2.bf16.msra.mxu1 %v3260_v7  ;;  %2436 = vmatprep.subr.bf16.mxu0 %v3265_v8  ;;  %v3347_v7 = vld [vmem:[#allocation8 + $0x568] ss:$16 sps:$4 sm:$0xff]  }
 0x2ee   :  { %2477 = vmatprep.subr.bf16.mxu1 %v3268_v9  ;;  %v3350_v8 = vld [vmem:[#allocation8 + $0x768] ss:$16 sps:$4 sm:$0xff]   ;;  %v3355_v9 = vld [vmem:[#allocation8 + $0x54c] ss:$16 sps:$4 sm:$0xff]  }
 0x2f0   :  { %2437 = vmatpush2.bf16.msra.mxu0 %v3263_v21  ;;  %v3358_v21 = vld [vmem:[#allocation8 + $0x74c] ss:$16 sps:$4 sm:$0xff]  }
 0x2f1   :  { %2478 = vmatpush2.bf16.msra.mxu1 %v3266_v11  ;;  %2438 = vmatprep.subr.bf16.mxu0 %v3271_v22  ;;  %v3353_v11 = vld [vmem:[#allocation8 + $0x548] ss:$16 sps:$4 sm:$0xff]  }
 0x2f2   :  { %2479 = vmatprep.subr.bf16.mxu1 %v3274_v12  ;;  %v3356_v22 = vld [vmem:[#allocation8 + $0x748] ss:$16 sps:$4 sm:$0xff]   ;;  %v3361_v12 = vld [vmem:[#allocation8 + $0x52c] ss:$16 sps:$4 sm:$0xff]  }
 0x2f4   :  { %2439 = vmatpush2.bf16.msra.mxu0 %v3269_v48  ;;  %v3364_v48 = vld [vmem:[#allocation8 + $0x72c] ss:$16 sps:$4 sm:$0xff]  }
 0x2f5   :  { %2480 = vmatpush2.bf16.msra.mxu1 %v3272_v14  ;;  %2490 = vmatprep.subr.bf16.mxu0 %v3277_v49  ;;  %v3359_v14 = vld [vmem:[#allocation8 + $0x528] ss:$16 sps:$4 sm:$0xff]  }
 0x2f6   :  { %2531 = vmatprep.subr.bf16.mxu1 %v3280_v15  ;;  %v3362_v49 = vld [vmem:[#allocation8 + $0x728] ss:$16 sps:$4 sm:$0xff]   ;;  %v3367_v15 = vld [vmem:[#allocation8 + $0x50c] ss:$16 sps:$4 sm:$0xff]  }
 0x2f7   :  { %2441 = vmatmul.mubr.bf16.vlgmr.msra.gmra.mxu0 %v3758_v55  ;;  %v3290_v55 = vld [vmem:[#allocation8 + $0x6a8] ss:$16 sps:$4 sm:$0xff]  }
 0x2f8   :  { %2482 = vmatmul.mubr.bf16.vlgmr.msra.gmra.mxu1 %v3760_v56  ;;  %2491 = vmatpush1.bf16.msra.mxu0 %v3275_v35  ;;  %v3298_v56 = vld [vmem:[#allocation8 + $0x68c] ss:$16 sps:$4 sm:$0xff]  }
 0x2f9   :  { %2522 = vmatprep.mubr.bf16.mxu0 %v3766_v58  ;;  %2532 = vmatpush1.bf16.msra.mxu1 %v3278_v16  ;;  %v3296_v58 = vld [vmem:[#allocation8 + $0x688] ss:$16 sps:$4 sm:$0xff]   ;;  %v3370_v35 = vld [vmem:[#allocation8 + $0x70c] ss:$16 sps:$4 sm:$0xff]  }
 0x2fa   :  { %2563 = vmatprep.mubr.bf16.mxu1 %v3768_v62  ;;  %2492 = vmatprep.subr.bf16.mxu0 %v3283_v36  ;;  %v3299_v62 = vld [vmem:[#allocation8 + $0x468] ss:$16 sps:$4 sm:$0xff]  }
 0x2fb   :  { %2533 = vmatprep.subr.bf16.mxu1 %v3286_v17  ;;  %v3365_v16 = vld [vmem:[#allocation8 + $0x508] ss:$16 sps:$4 sm:$0xff]   ;;  %v3788_v17 = vld [vmem:[#allocation10] sm:$0xff] }
 0x2fc   :  { %2493 = vmatpush1.bf16.msra.mxu0 %v3281_v50  ;;  %v3368_v36 = vld [vmem:[#allocation8 + $0x708] ss:$16 sps:$4 sm:$0xff]  }
 0x2fd   :  { %2534 = vmatpush1.bf16.msra.mxu1 %v3284_v23  ;;  %2494 = vmatprep.subr.bf16.mxu0 %v3289_v51  ;;  %v3790_v50 = vld [vmem:[#allocation10 + $0x8] sm:$0xff]  ;;  %v951_v23 = vrot.slane %v3788_v17, %v3630_v20 }
 0x2fe   :  { %2535 = vmatprep.subr.bf16.mxu1 %v3292_v24  ;;  %v955_v51 = vrot.slane %v3790_v50, %v3630_v20 }
 0x300   :  { %2495 = vmatpush1.bf16.msra.mxu0 %v3287_v27 }
 0x301   :  { %2536 = vmatpush1.bf16.msra.mxu1 %v3290_v55  ;;  %2496 = vmatprep.subr.bf16.mxu0 %v3295_v25 }
 0x302   :  { %2537 = vmatprep.subr.bf16.mxu1 %v3298_v56 }
 0x304   :  { %2497 = vmatpush1.bf16.msra.mxu0 %v3293_v28 }
 0x305   :  { %2538 = vmatpush1.bf16.msra.mxu1 %v3296_v58  ;;  %2498 = vmatprep.subr.bf16.mxu0 %v3301_v26 }
 0x306   :  { %2539 = vmatprep.subr.bf16.mxu1 %v3304_v45 }
 0x308   :  { %2499 = vmatpush1.bf16.msra.mxu0 %v3299_v62 }
 0x309   :  { %2540 = vmatpush1.bf16.msra.mxu1 %v3302_v29  ;;  %2500 = vmatprep.subr.bf16.mxu0 %v3307_v31 }
 0x30a   :  { %2541 = vmatprep.subr.bf16.mxu1 %v3310_v46 }
 0x30c   :  { %2501 = vmatpush1.bf16.msra.mxu0 %v3305_v32 }
 0x30d   :  { %2542 = vmatpush1.bf16.msra.mxu1 %v3308_v19  ;;  %2502 = vmatprep.subr.bf16.mxu0 %v3313_v33 }
 0x30e   :  { %2543 = vmatprep.subr.bf16.mxu1 %v3316_v30 }
 0x310   :  { %2503 = vmatpush1.bf16.msra.mxu0 %v3311_v34 }
 0x311   :  { %2544 = vmatpush1.bf16.msra.mxu1 %v3314_v13  ;;  %2504 = vmatprep.subr.bf16.mxu0 %v3319_v37 }
 0x312   :  { %2545 = vmatprep.subr.bf16.mxu1 %v3322_v18 }
 0x314   :  { %2505 = vmatpush1.bf16.msra.mxu0 %v3317_v38 }
 0x315   :  { %2546 = vmatpush1.bf16.msra.mxu1 %v3320_v39  ;;  %2506 = vmatprep.subr.bf16.mxu0 %v3325_v3 }
 0x316   :  { %2547 = vmatprep.subr.bf16.mxu1 %v3328_v40 }
 0x318   :  { %2507 = vmatpush2.bf16.msra.mxu0 %v3323_v57 }
 0x319   :  { %2548 = vmatpush2.bf16.msra.mxu1 %v3326_v42  ;;  %2508 = vmatprep.subr.bf16.mxu0 %v3331_v41 }
 0x31a   :  { %2549 = vmatprep.subr.bf16.mxu1 %v3334_v43 }
 0x31c   :  { %2509 = vmatpush2.bf16.msra.mxu0 %v3329_v54 }
 0x31d   :  { %2550 = vmatpush2.bf16.msra.mxu1 %v3332_v44  ;;  %2510 = vmatprep.subr.bf16.mxu0 %v3337_v47  ;;  %v3798_v44 = vld [vmem:[#allocation10 + $0x10] sm:$0xff]  ;;  %v3800_v47 = vld [vmem:[#allocation10 + $0x18] sm:$0xff] }
 0x31e   :  { %2551 = vmatprep.subr.bf16.mxu1 %v3340_v52  ;;  %v959_v52 = vrot.slane %v3798_v44, %v3630_v20 }
 0x320   :  { %2511 = vmatpush2.bf16.msra.mxu0 %v3335_v53 }
 0x321   :  { %2552 = vmatpush2.bf16.msra.mxu1 %v3338_v59  ;;  %2512 = vmatprep.subr.bf16.mxu0 %v3343_v60  ;;  %v963_v59 = vrot.slane %v3800_v47, %v3630_v20 }
 0x322   :  { %2553 = vmatprep.subr.bf16.mxu1 %v3346_v61 }
 0x324   :  { %2513 = vmatpush2.bf16.msra.mxu0 %v3341_v63 }
 0x325   :  { %2554 = vmatpush2.bf16.msra.mxu1 %v3344_v4  ;;  %2514 = vmatprep.subr.bf16.mxu0 %v3349_v5 }
 0x326   :  { %2555 = vmatprep.subr.bf16.mxu1 %v3352_v6 }
 0x328   :  { %2515 = vmatpush2.bf16.msra.mxu0 %v3347_v7 }
 0x329   :  { %2556 = vmatpush2.bf16.msra.mxu1 %v3350_v8  ;;  %2516 = vmatprep.subr.bf16.mxu0 %v3355_v9 }
 0x32a   :  { %2557 = vmatprep.subr.bf16.mxu1 %v3358_v21 }
 0x32c   :  { %2517 = vmatpush2.bf16.msra.mxu0 %v3353_v11 }
 0x32d   :  { %2558 = vmatpush2.bf16.msra.mxu1 %v3356_v22  ;;  %2518 = vmatprep.subr.bf16.mxu0 %v3361_v12 }
 0x32e   :  { %2559 = vmatprep.subr.bf16.mxu1 %v3364_v48 }
 0x330   :  { %2519 = vmatpush2.bf16.msra.mxu0 %v3359_v14 }
 0x331   :  { %2560 = vmatpush2.bf16.msra.mxu1 %v3362_v49  ;;  %2520 = vmatprep.subr.bf16.mxu0 %v3367_v15 }
 0x332   :  { %2561 = vmatprep.subr.bf16.mxu1 %v3370_v35 }
 0x334   :  { %2521 = vmatpush2.bf16.msra.mxu0 %v3365_v16 }
 0x335   :  { %2562 = vmatpush2.bf16.msra.mxu1 %v3368_v36 }
 0x337   :  { %2523 = vmatmul.mubr.bf16.vlgmr.msra.gmra.mxu0 %v3774_v1  ;;  %v2278_v24 = vpop.f32.mrf.mxu0  ;;  %v2319_v27 = vpop.f32.mrf.mxu1 }
 0x338   :  { %2564 = vmatmul.mubr.bf16.vlgmr.msra.gmra.mxu1 %v3778_v10  ;;  %v2279_v55 = vadd.f32 %v2278_v24, %v951_v23 }
 0x339   :  { %v2280_v25 = vpop.f32.mrf.mxu0  ;;  %v2321_v56 = vpop.f32.mrf.mxu1 }
 0x33a   :  { %v2320_v28 = vadd.f32 %v2319_v27, %v2279_v55  ;;  %v2281_v58 = vadd.f32 %v2280_v25, %v955_v51 }
 0x33b   :  { %v2282_v26 = vpop.f32.mrf.mxu0  ;;  %v2323_v45 = vpop.f32.mrf.mxu1 }
 0x33c   :  { %v2322_v62 = vadd.f32 %v2321_v56, %v2281_v58 }
 0x33d   :  { %v2283_v29 = vpop.f32.mrf.mxu0  ;;  %v2324_v31 = vpop.f32.mrf.mxu1 }
 0x377   :  { %v2360_v46 = vpop.f32.mrf.mxu0  ;;  %v2401_v32 = vpop.f32.mrf.mxu1 }
 0x378   :  { %v2361_v19 = vadd.f32 %v2360_v46, %v2320_v28 }
 0x379   :  { %v2362_v33 = vpop.f32.mrf.mxu0  ;;  %v2403_v30 = vpop.f32.mrf.mxu1 }
 0x37a   :  { %v2402_v1 = vadd.f32 %v2401_v32, %v2361_v19  ;;  %v2363_v34 = vadd.f32 %v2362_v33, %v2322_v62 }
 0x37b   :  { %v2364_v13 = vpop.f32.mrf.mxu0  ;;  %v2405_v37 = vpop.f32.mrf.mxu1 }
 0x37c   :  { %v2404_v10 = vadd.f32 %v2403_v30, %v2363_v34  ;;  %v2576_v60 = vmul.f32 0.70710677, %v2402_v1  ;;  %v2572_v27 = vmul.f32 0.5, %v2402_v1 }
 0x37d   :  { %v2365_v18 = vpop.f32.mrf.mxu0  ;;  %v2406_v38 = vpop.f32.mrf.mxu1 }
 0x37e   :  { %v2577_v53 = vmul.f32 0.70710677, %v2404_v10  ;;  %v2573_v24 = vmul.f32 0.5, %v2404_v10 }
 0x380   :  { %3389 = verf.f32 %v2577_v53  ;;  %v2637_v53 = vrot.slane %v3800_v47, %v3705_v0 }
 0x381   :  { %3391 = verf.f32 %v2576_v60 }
 0x38d   :  { %v3390_v16 = vpop.eup %3389 }
 0x38e   :  { %v3392_v36 = vpop.eup %3391  ;;  %v2585_v23 = vadd.f32 1.0, %v3390_v16 }
 0x38f   :  { %v2584_v51 = vadd.f32 1.0, %v3392_v36 }
 0x390   :  { %v2589_v55 = vmul.f32 %v2585_v23, %v2573_v24 }
 0x391   :  { %v2588_v25 = vmul.f32 %v2584_v51, %v2572_v27 }
 0x392   :  { %v2600_v26 = vmul.f32 %v2589_v55, %v2589_v55 }
 0x393   :  { %v2599_v62 = vmul.f32 %v2588_v25, %v2588_v25  ;;  %v2592_v32 = vadd.f32 %v2589_v55, %v2588_v25 }
 0x395   :  { %v2603_v34 = vadd.f32 %v2600_v26, %v2599_v62 }
 0x3b7   :  { %v2442_v39 = vpop.f32.mrf.mxu0 }
 0x3b8   :  { %v2483_v3 = vpop.f32.mrf.mxu1  ;;  %v2443_v61 = vadd.f32 %v2442_v39, %v959_v52  ;;  %v2633_v52 = vrot.slane %v3798_v44, %v3705_v0 }
 0x3b9   :  { %v2444_v40 = vpop.f32.mrf.mxu0 }
 0x3ba   :  { %v2485_v57 = vpop.f32.mrf.mxu1  ;;  %v2445_v63 = vadd.f32 %v2444_v40, %v963_v59  ;;  %v2484_v4 = vadd.f32 %v2483_v3, %v2443_v61 }
 0x3bb   :  { %v2446_v42 = vpop.f32.mrf.mxu0 }
 0x3bc   :  { %v2487_v41 = vpop.f32.mrf.mxu1  ;;  %v2486_v6 = vadd.f32 %v2485_v57, %v2445_v63 }
 0x3bd   :  { %v2447_v43 = vpop.f32.mrf.mxu0 }
 0x3be   :  { %v2488_v54 = vpop.f32.mrf.mxu1  ;;  %v2625_v43 = vrot.slane %v3788_v17, %v3705_v0 }
 0x3bf   :  { %v2629_v54 = vrot.slane %v3790_v50, %v3705_v0 }
 0x3f7   :  { %v2524_v5 = vpop.f32.mrf.mxu0 }
 0x3f8   :  { %v2525_v7 = vadd.f32 %v2524_v5, %v2484_v4  ;;  %v2565_v8 = vpop.f32.mrf.mxu1  ;;  %v2645_v5 = vrot.slane %v3788_v17, %v3708_v2 }
 0x3f9   :  { %v2526_v9 = vpop.f32.mrf.mxu0 }
 0x3fa   :  { %v2566_v21 = vadd.f32 %v2565_v8, %v2525_v7  ;;  %v2527_v11 = vadd.f32 %v2526_v9, %v2486_v6  ;;  %v2567_v22 = vpop.f32.mrf.mxu1  ;;  %v2649_v6 = vrot.slane %v3790_v50, %v3708_v2  ;;  %v2653_v7 = vrot.slane %v3798_v44, %v3708_v2 }
 0x3fb   :  { %v2528_v12 = vpop.f32.mrf.mxu0  ;;  %v2657_v8 = vrot.slane %v3800_v47, %v3708_v2 }
 0x3fc   :  { %v2578_v48 = vmul.f32 0.70710677, %v2566_v21  ;;  %v2568_v14 = vadd.f32 %v2567_v22, %v2527_v11  ;;  %v2569_v49 = vpop.f32.mrf.mxu1  ;;  %v2574_v28 = vmul.f32 0.5, %v2566_v21 }
 0x3fd   :  { %v2529_v15 = vpop.f32.mrf.mxu0 }
 0x3fe   :  { %3393 = verf.f32 %v2578_v48  ;;  %v2579_v20 = vmul.f32 0.70710677, %v2568_v14  ;;  %v2570_v35 = vpop.f32.mrf.mxu1  ;;  %v2575_v31 = vmul.f32 0.5, %v2568_v14 }
 0x400   :  { %3395 = verf.f32 %v2579_v20 }
 0x40b   :  { %v3394_v56 = vpop.eup %3393 }
 0x40c   :  { %v2586_v58 = vadd.f32 1.0, %v3394_v56 }
 0x40d   :  { %v3396_v45 = vpop.eup %3395 }
 0x40e   :  { %v2590_v29 = vmul.f32 %v2586_v58, %v2574_v28  ;;  %v2587_v46 = vadd.f32 1.0, %v3396_v45 }
 0x410   :  { %v2591_v19 = vmul.f32 %v2587_v46, %v2575_v31  ;;  %v2593_v33 = vadd.f32 %v2592_v32, %v2590_v29  ;;  %v2601_v30 = vmul.f32 %v2590_v29, %v2590_v29 }
 0x412   :  { %v2594_v13 = vadd.f32 %v2593_v33, %v2591_v19  ;;  %v2602_v37 = vmul.f32 %v2591_v19, %v2591_v19  ;;  %v2604_v10 = vadd.f32 %v2603_v34, %v2601_v30 }
 0x414   :  { %2595 = vadd.xlane.f32.xlu0 %v2594_v13  ;;  %v2605_v1 = vadd.f32 %v2604_v10, %v2602_v37 }
 0x416   :  { %2606 = vadd.xlane.f32.xlu1 %v2605_v1 }
 0x49d   :  { %v2596_v18 = vpop.xlane.xlu0 %2595 }
 0x49e   :  { %v2598_v38 = vmul.f32 0.001953125, %v2596_v18 }
 0x49f   :  { %v2607_v39 = vpop.xlane.xlu1 %2606 }
 0x4a0   :  { %v2608_v3 = vmul.f32 0.001953125, %v2607_v39  ;;  %v2609_v40 = vmul.f32 %v2598_v38, %v2598_v38  ;;  %v2612_v59 = vsub.f32 %v2588_v25, %v2598_v38  ;;  %v2613_v60 = vsub.f32 %v2589_v55, %v2598_v38 }
 0x4a1   :  { %v2614_v61 = vsub.f32 %v2590_v29, %v2598_v38  ;;  %v2615_v63 = vsub.f32 %v2591_v19, %v2598_v38 }
 0x4a2   :  { %v2610_v57 = vsub.f32 %v2608_v3, %v2609_v40 }
 0x4a4   :  { %v2611_v42 = vmax.f32 %v2610_v57, 0.0 }
 0x4a6   :  { %v2616_v41 = vadd.f32 1e-05, %v2611_v42 }
 0x4a8   :  { %3397 = vrsqrt.f32 %v2616_v41 }
 0x4b5   :  { %v3398_v4 = vpop.eup %3397 }
 0x4b6   :  { %v2618_v9 = vmul.f32 %v3398_v4, %v2612_v59  ;;  %v2619_v21 = vmul.f32 %v3398_v4, %v2613_v60  ;;  %v2620_v0 = vmul.f32 %v3398_v4, %v2614_v61  ;;  %v2621_v11 = vmul.f32 %v3398_v4, %v2615_v63 }
 0x4b8   :  { %v2638_v22 = vmul.f32 %v2625_v43, %v2618_v9  ;;  %v2639_v12 = vmul.f32 %v2629_v54, %v2619_v21  ;;  %v2640_v48 = vmul.f32 %v2633_v52, %v2620_v0  ;;  %v2641_v14 = vmul.f32 %v2637_v53, %v2621_v11 }
 0x4ba   :  { %v2658_v17 = vadd.f32 %v2645_v5, %v2638_v22  ;;  %v2659_v49 = vadd.f32 %v2649_v6, %v2639_v12  ;;  %v2660_v15 = vadd.f32 %v2653_v7, %v2640_v48  ;;  %v2661_v50 = vadd.f32 %v2657_v8, %v2641_v14 }
 0x4bc   :  { %v2963_v20 = vpack.c.bf16 %v2659_v49, %v2658_v17  ;;  %v2964_v35 = vpack.c.bf16 %v2661_v50, %v2660_v15 }
 0x4be   :  { %2678 = vst [vmem:[#allocation11] sm:$0xff] %v2963_v20  ;;  %2679 = vst [vmem:[#allocation11 + $0x8] sm:$0xff] %v2964_v35 }
 0x4bf   :  { %3510 = shalt.err (!%p3507_p1)
}
 0x4c0   :  { %2689 = dma.vmem_to_hbm [thread:$0]  %s2687_s4, 256, %s3830_s5, [#allocation4]  }
 0x4c1   :  { %3525 = dma.done.wait [#allocation4], 256  }
 0x4c2   :  { %3526 = vsyncadd [#allocation4], 4294967040 }
 0x4c3   :  { %2693 = vsyncpa [#allocation3], 1 }
 0x4c4   :  { %2694 = vsyncpa [#allocation6], 1 }
 0x4c5   :  { %2695 = vsyncpa [#allocation9], 1 }
 0x4c6   :  { %2696 = vsyncpa [#allocation4], 1 }

</bundles_post_ra>
